<compile_context>
chip_gen: v6e
topology: v6e:2x2x1
jax: 0.10.0
libtpu: 0.0.40
codegen_flags: <defaults>
</compile_context>

<pallas_src>
import functools
import numpy as np
import jax
import jax.numpy as jnp
from jax import lax
from jax.experimental import pallas as pl
from jax.experimental.pallas import tpu as pltpu

EPS = 1e-5
INV_SQRT2 = 0.7071067811865476


def _erf_approx(x):
    # Abramowitz & Stegun 7.1.26, max abs error ~1.5e-7 (well within the 2e-3 tolerance).
    p = 0.3275911
    a1, a2, a3, a4, a5 = 0.254829592, -0.284496736, 1.421413741, -1.453152027, 1.061405429
    s = jnp.where(x >= 0.0, 1.0, -1.0)
    ax = jnp.abs(x)
    t = 1.0 / (1.0 + p * ax)
    poly = t * (a1 + t * (a2 + t * (a3 + t * (a4 + t * a5))))
    return s * (1.0 - poly * jnp.exp(-ax * ax))


def _gelu(x):
    return 0.5 * x * (1.0 + _erf_approx(x * INV_SQRT2))


def _unet_down_kernel(N, H, W, Cout,
                      xp_ref, w1_ref, w2_ref, gb_ref,
                      bmat_ref, rpad_ref, er_ref, or_ref, ec_ref, oc_ref,
                      o_ref, y1p_ref):
    f32 = jnp.float32
    lanes = W * Cout
    inv_cnt = 1.0 / float(N * H * W)
    bmat = bmat_ref[...]            # [lanes, lanes] : per-channel reduce + broadcast over lane groups
    gb = gb_ref[...]                # [4, lanes]     : gamma1 / beta1 / gamma2 / beta2 (lane-tiled)

    def conv_layer(src_ref, w_ref):
        """3x3 conv as 3 row-banded matmuls per image (lane-dense [H, W*Cout] output);
        returns per-image pre-BN activations plus per-lane (channel-broadcast) mean/var."""
        w_taps = [w_ref[0], w_ref[1], w_ref[2]]          # hoisted: loaded once, reused per image
        accs = []
        s = jnp.zeros((1, lanes), f32)
        q = jnp.zeros((1, lanes), f32)
        for n in range(N):
            a = None
            for dh in range(3):
                rows = src_ref[n, dh:dh + H, :]          # [H, W*Cin_layer]
                contrib = jnp.dot(rows, w_taps[dh], preferred_element_type=f32)
                a = contrib if a is None else a + contrib            # [H, W*Cout]
            accs.append(a)
            # single-pass BN stats (conv bias omitted: cancelled exactly by mean subtraction)
            s = s + jnp.sum(a, axis=0, keepdims=True)
            q = q + jnp.sum(a * a, axis=0, keepdims=True)
        # one per-channel reduce+broadcast matmul per statistic (not per image)
        mean = jnp.dot(s, bmat, preferred_element_type=f32) * inv_cnt
        meansq = jnp.dot(q, bmat, preferred_element_type=f32) * inv_cnt
        var = meansq - mean * mean
        return accs, mean, var

    # ---- conv1 -> BN1 (batch stats) -> GELU -> y1 (zero H-pad) into VMEM scratch ----
    accs1, mean1, var1 = conv_layer(xp_ref, w1_ref)
    scale1 = gb[0:1, :] * lax.rsqrt(var1 + EPS)
    shift1 = gb[1:2, :] - mean1 * scale1
    rpad = rpad_ref[...]                                             # [H+2, H]
    for n in range(N):
        y1 = _gelu(accs1[n] * scale1 + shift1)                       # [H, W*Cout]
        # row zero-padding via a 0/1 selection matmul -> full-block aligned, lane-dense store
        y1p_ref[n] = jnp.dot(rpad, y1, preferred_element_type=f32)   # [H+2, W*Cout]

    # ---- conv2 -> BN2 -> GELU -> 2x2 max-pool ----
    accs2, mean2, var2 = conv_layer(y1p_ref, w2_ref)
    scale2 = gb[2:3, :] * lax.rsqrt(var2 + EPS)
    shift2 = gb[3:4, :] - mean2 * scale2
    er, orr, ec, oc = er_ref[...], or_ref[...], ec_ref[...], oc_ref[...]
    for n in range(N):
        y2 = _gelu(accs2[n] * scale2 + shift2)                       # [H, W*Cout]
        rowmax = jnp.maximum(jnp.dot(er, y2, preferred_element_type=f32),   # even rows
                             jnp.dot(orr, y2, preferred_element_type=f32))  # odd rows
        o_ref[n] = jnp.maximum(jnp.dot(rowmax, ec, preferred_element_type=f32),   # even col groups
                               jnp.dot(rowmax, oc, preferred_element_type=f32))   # odd col groups


def _banded_conv_weights(w_oihw, W):
    """torch [Cout, Cin, 3, 3] -> [3, W*Cin, W*Cout] banded matrices with edge clipping:
    wrow[dh][wi*Cin+ci, wo*Cout+co] = W[co, ci, dh, wi-wo+1] for wi-wo+1 in {0,1,2} (else 0).
    The clipping at the edges reproduces zero-padding along W exactly."""
    cout, cin = int(w_oihw.shape[0]), int(w_oihw.shape[1])
    taps = jnp.transpose(w_oihw, (2, 3, 1, 0))                       # [dh, dw, ci, co]
    band = np.zeros((3, W, W), np.float32)
    for dw in range(3):
        wi = np.arange(W)
        wo = wi - dw + 1
        m = (wo >= 0) & (wo < W)
        band[dw, wi[m], wo[m]] = 1.0
    wrow = jnp.einsum('dab,edij->eaibj', jnp.asarray(band), taps)    # [dh, wi, ci, wo, co]
    return wrow.reshape(3, W * cin, W * cout)


def _constant_mats(H, W, Cout):
    lanes = W * Cout
    Ho, Wo = H // 2, W // 2
    lane = np.arange(lanes)
    # per-channel sum over the W lane-groups, broadcast back to every group
    bmat = (lane[:, None] % Cout == lane[None, :] % Cout).astype(np.float32)       # [lanes, lanes]
    # row zero-pad: [H+2, H] with identity shifted down by one row
    rpad = np.zeros((H + 2, H), np.float32)
    rpad[1 + np.arange(H), np.arange(H)] = 1.0
    # even/odd row selectors for the 2x2 pool
    er = np.zeros((Ho, H), np.float32)
    er[np.arange(Ho), 2 * np.arange(Ho)] = 1.0
    orr = np.zeros((Ho, H), np.float32)
    orr[np.arange(Ho), 2 * np.arange(Ho) + 1] = 1.0
    # even/odd column-group selectors (lane index = w*Cout + c)
    wo = np.arange(Wo)[:, None]
    co = np.arange(Cout)[None, :]
    ec = np.zeros((lanes, Wo * Cout), np.float32)
    oc = np.zeros((lanes, Wo * Cout), np.float32)
    ec[(2 * Cout * wo + co).ravel(), (Cout * wo + co).ravel()] = 1.0
    oc[(2 * Cout * wo + Cout + co).ravel(), (Cout * wo + co).ravel()] = 1.0
    return tuple(jnp.asarray(a) for a in (bmat, rpad, er, orr, ec, oc))


@jax.jit
def unet_down_forward(x_nchw, params):
    """UnetDown forward: NCHW in -> NCHW out with spatial dims halved. One fused Pallas kernel."""
    x = jnp.transpose(x_nchw, (0, 2, 3, 1)).astype(jnp.float32)                    # NHWC
    N, H, W, Cin = (int(d) for d in x.shape)
    Cout = int(params["w1"].shape[0])
    assert H % 2 == 0 and W % 2 == 0
    lanes = W * Cout

    # only glue data movement: zero-pad H by 1 and pack to [N, H+2, W*Cin]
    xp = jnp.pad(x, ((0, 0), (1, 1), (0, 0), (0, 0))).reshape(N, H + 2, W * Cin)

    w1row = _banded_conv_weights(params["w1"].astype(jnp.float32), W)               # [3, W*Cin,  W*Cout]
    w2row = _banded_conv_weights(params["w2"].astype(jnp.float32), W)               # [3, W*Cout, W*Cout]

    # BN affine params tiled onto the packed lane layout, stacked into one [4, lanes] array
    gb = jnp.stack([jnp.tile(params["g1"].astype(jnp.float32), W),
                    jnp.tile(params["beta1"].astype(jnp.float32), W),
                    jnp.tile(params["g2"].astype(jnp.float32), W),
                    jnp.tile(params["beta2"].astype(jnp.float32), W)], axis=0)
    # NOTE: conv biases b1/b2 are intentionally not passed -- training-mode BatchNorm subtracts
    # the batch mean, which cancels any per-channel bias exactly.

    bmat, rpad, er, orr, ec, oc = _constant_mats(H, W, Cout)

    kernel = functools.partial(_unet_down_kernel, N, H, W, Cout)
    vspec = pl.BlockSpec(memory_space=pltpu.MemorySpace.VMEM)
    out = pl.pallas_call(
        kernel,
        out_shape=jax.ShapeDtypeStruct((N, H // 2, (W // 2) * Cout), jnp.float32),
        in_specs=[vspec] * 10,
        out_specs=vspec,
        scratch_shapes=[pltpu.VMEM((N, H + 2, lanes), jnp.float32)],                # padded y1
    )(xp, w1row, w2row, gb, bmat, rpad, er, orr, ec, oc)

    out = out.reshape(N, H // 2, W // 2, Cout)
    return jnp.transpose(out, (0, 3, 1, 2))                                          # NCHW


def _reference(x_nchw, params):
    # Plain-JAX reference (true erf, lax conv WITH bias, training-mode BN, reduce_window pool).
    x = jnp.transpose(x_nchw, (0, 2, 3, 1)).astype(jnp.float32)

    def block(xx, w, b, g, be):
        wf = jnp.transpose(w, (2, 3, 1, 0))  # HWIO
        y = lax.conv_general_dilated(xx, wf, (1, 1), ((1, 1), (1, 1)),
                                     dimension_numbers=("NHWC", "HWIO", "NHWC"))
        y = y + b
        mean = jnp.mean(y, axis=(0, 1, 2), keepdims=True)
        var = jnp.mean((y - mean) ** 2, axis=(0, 1, 2), keepdims=True)
        y = g * (y - mean) / jnp.sqrt(var + EPS) + be
        return 0.5 * y * (1.0 + jax.scipy.special.erf(y * INV_SQRT2))

    y1 = block(x, params["w1"], params["b1"], params["g1"], params["beta1"])
    y2 = block(y1, params["w2"], params["b2"], params["g2"], params["beta2"])
    pooled = lax.reduce_window(y2, -jnp.inf, lax.max, (1, 2, 2, 1), (1, 2, 2, 1), "VALID")
    return jnp.transpose(pooled, (0, 3, 1, 2))


if __name__ == "__main__":
    N, Cin, Cout, H, W = 2, 4, 8, 16, 16
    key = jax.random.PRNGKey(0)
    ks = jax.random.split(key, 9)
    params = {
        "w1": 0.2 * jax.random.normal(ks[0], (Cout, Cin, 3, 3), jnp.float32),
        "b1": 0.05 * jax.random.normal(ks[1], (Cout,), jnp.float32),
        "g1": 1.0 + 0.1 * jax.random.normal(ks[2], (Cout,), jnp.float32),
        "beta1": 0.05 * jax.random.normal(ks[3], (Cout,), jnp.float32),
        "w2": 0.2 * jax.random.normal(ks[4], (Cout, Cout, 3, 3), jnp.float32),
        "b2": 0.05 * jax.random.normal(ks[5], (Cout,), jnp.float32),
        "g2": 1.0 + 0.1 * jax.random.normal(ks[6], (Cout,), jnp.float32),
        "beta2": 0.05 * jax.random.normal(ks[7], (Cout,), jnp.float32),
    }
    x = jax.random.normal(ks[8], (N, Cin, H, W), jnp.float32)

    out = jax.block_until_ready(unet_down_forward(x, params))
    ref = jax.block_until_ready(_reference(x, params))
    assert out.shape == (N, Cout, H // 2, W // 2), out.shape
    np.testing.assert_allclose(np.asarray(out), np.asarray(ref), atol=2e-3, rtol=2e-3)
    print("KERNEL_OK")
</pallas_src>

<mosaic_0001>
module attributes {stable_mosaic.version = 11 : i64} {
  func.func @_unet_down_kernel(%arg0: memref<2x18x64xf32, #tpu.memory_space<vmem>>, %arg1: memref<3x64x128xf32, #tpu.memory_space<vmem>>, %arg2: memref<3x128x128xf32, #tpu.memory_space<vmem>>, %arg3: memref<4x128xf32, #tpu.memory_space<vmem>>, %arg4: memref<128x128xf32, #tpu.memory_space<vmem>>, %arg5: memref<18x16xf32, #tpu.memory_space<vmem>>, %arg6: memref<8x16xf32, #tpu.memory_space<vmem>>, %arg7: memref<8x16xf32, #tpu.memory_space<vmem>>, %arg8: memref<128x64xf32, #tpu.memory_space<vmem>>, %arg9: memref<128x64xf32, #tpu.memory_space<vmem>>, %arg10: memref<2x8x64xf32, #tpu.memory_space<vmem>>, %arg11: memref<2x18x128xf32, #tpu.memory_space<vmem>>) attributes {dimension_semantics = [], scalar_prefetch = 0 : i64, scratch_operands = 1 : i64, tpu.core_type = #tpu.core_type<tc>} {
    %c0 = arith.constant 0 : index
    %c0_0 = arith.constant 0 : index
    %0 = vector.load %arg4[%c0, %c0_0] : memref<128x128xf32, #tpu.memory_space<vmem>>, vector<128x128xf32>
    %c0_1 = arith.constant 0 : index
    %c0_2 = arith.constant 0 : index
    %1 = vector.load %arg3[%c0_1, %c0_2] : memref<4x128xf32, #tpu.memory_space<vmem>>, vector<4x128xf32>
    %c0_3 = arith.constant 0 : index
    %c0_4 = arith.constant 0 : index
    %c0_5 = arith.constant 0 : index
    %2 = vector.load %arg1[%c0_3, %c0_4, %c0_5] : memref<3x64x128xf32, #tpu.memory_space<vmem>>, vector<1x64x128xf32>
    %3 = vector.shape_cast %2 : vector<1x64x128xf32> to vector<64x128xf32>
    %c1 = arith.constant 1 : index
    %c0_6 = arith.constant 0 : index
    %c0_7 = arith.constant 0 : index
    %4 = vector.load %arg1[%c1, %c0_6, %c0_7] : memref<3x64x128xf32, #tpu.memory_space<vmem>>, vector<1x64x128xf32>
    %5 = vector.shape_cast %4 : vector<1x64x128xf32> to vector<64x128xf32>
    %c2 = arith.constant 2 : index
    %c0_8 = arith.constant 0 : index
    %c0_9 = arith.constant 0 : index
    %6 = vector.load %arg1[%c2, %c0_8, %c0_9] : memref<3x64x128xf32, #tpu.memory_space<vmem>>, vector<1x64x128xf32>
    %7 = vector.shape_cast %6 : vector<1x64x128xf32> to vector<64x128xf32>
    %cst = arith.constant 0.000000e+00 : f32
    %8 = vector.broadcast %cst : f32 to vector<1x128xf32>
    %cst_10 = arith.constant 0.000000e+00 : f32
    %9 = vector.broadcast %cst_10 : f32 to vector<1x128xf32>
    %c0_11 = arith.constant 0 : index
    %c0_12 = arith.constant 0 : index
    %c0_13 = arith.constant 0 : index
    %10 = vector.load %arg0[%c0_11, %c0_12, %c0_13] : memref<2x18x64xf32, #tpu.memory_space<vmem>>, vector<1x16x64xf32>
    %11 = vector.shape_cast %10 : vector<1x16x64xf32> to vector<16x64xf32>
    %cst_14 = arith.constant dense<0.000000e+00> : vector<16x128xf32>
    %12 = tpu.matmul %11, %3, %cst_14 {dimension_numbers = #tpu.dot_dimension_numbers<[1], [0], [0], [1], [0, 0, 1, 1], [], []>} : vector<16x64xf32>, vector<64x128xf32>, vector<16x128xf32> -> vector<16x128xf32>
    %c0_15 = arith.constant 0 : index
    %c1_16 = arith.constant 1 : index
    %c0_17 = arith.constant 0 : index
    %13 = vector.load %arg0[%c0_15, %c1_16, %c0_17] : memref<2x18x64xf32, #tpu.memory_space<vmem>>, vector<1x16x64xf32>
    %14 = vector.shape_cast %13 : vector<1x16x64xf32> to vector<16x64xf32>
    %cst_18 = arith.constant dense<0.000000e+00> : vector<16x128xf32>
    %15 = tpu.matmul %14, %5, %cst_18 {dimension_numbers = #tpu.dot_dimension_numbers<[1], [0], [0], [1], [0, 0, 1, 1], [], []>} : vector<16x64xf32>, vector<64x128xf32>, vector<16x128xf32> -> vector<16x128xf32>
    %16 = arith.addf %12, %15 : vector<16x128xf32>
    %c0_19 = arith.constant 0 : index
    %c2_20 = arith.constant 2 : index
    %c0_21 = arith.constant 0 : index
    %17 = vector.load %arg0[%c0_19, %c2_20, %c0_21] : memref<2x18x64xf32, #tpu.memory_space<vmem>>, vector<1x16x64xf32>
    %18 = vector.shape_cast %17 : vector<1x16x64xf32> to vector<16x64xf32>
    %cst_22 = arith.constant dense<0.000000e+00> : vector<16x128xf32>
    %19 = tpu.matmul %18, %7, %cst_22 {dimension_numbers = #tpu.dot_dimension_numbers<[1], [0], [0], [1], [0, 0, 1, 1], [], []>} : vector<16x64xf32>, vector<64x128xf32>, vector<16x128xf32> -> vector<16x128xf32>
    %20 = arith.addf %16, %19 : vector<16x128xf32>
    %cst_23 = arith.constant dense<0.000000e+00> : vector<128xf32>
    %21 = vector.multi_reduction <add>, %20, %cst_23 [0] : vector<16x128xf32> to vector<128xf32>
    %22 = vector.shape_cast %21 : vector<128xf32> to vector<1x128xf32>
    %23 = arith.addf %8, %22 : vector<1x128xf32>
    %24 = arith.mulf %20, %20 : vector<16x128xf32>
    %cst_24 = arith.constant dense<0.000000e+00> : vector<128xf32>
    %25 = vector.multi_reduction <add>, %24, %cst_24 [0] : vector<16x128xf32> to vector<128xf32>
    %26 = vector.shape_cast %25 : vector<128xf32> to vector<1x128xf32>
    %27 = arith.addf %9, %26 : vector<1x128xf32>
    %c1_25 = arith.constant 1 : index
    %c0_26 = arith.constant 0 : index
    %c0_27 = arith.constant 0 : index
    %28 = vector.load %arg0[%c1_25, %c0_26, %c0_27] : memref<2x18x64xf32, #tpu.memory_space<vmem>>, vector<1x16x64xf32>
    %29 = vector.shape_cast %28 : vector<1x16x64xf32> to vector<16x64xf32>
    %cst_28 = arith.constant dense<0.000000e+00> : vector<16x128xf32>
    %30 = tpu.matmul %29, %3, %cst_28 {dimension_numbers = #tpu.dot_dimension_numbers<[1], [0], [0], [1], [0, 0, 1, 1], [], []>} : vector<16x64xf32>, vector<64x128xf32>, vector<16x128xf32> -> vector<16x128xf32>
    %c1_29 = arith.constant 1 : index
    %c1_30 = arith.constant 1 : index
    %c0_31 = arith.constant 0 : index
    %31 = vector.load %arg0[%c1_29, %c1_30, %c0_31] : memref<2x18x64xf32, #tpu.memory_space<vmem>>, vector<1x16x64xf32>
    %32 = vector.shape_cast %31 : vector<1x16x64xf32> to vector<16x64xf32>
    %cst_32 = arith.constant dense<0.000000e+00> : vector<16x128xf32>
    %33 = tpu.matmul %32, %5, %cst_32 {dimension_numbers = #tpu.dot_dimension_numbers<[1], [0], [0], [1], [0, 0, 1, 1], [], []>} : vector<16x64xf32>, vector<64x128xf32>, vector<16x128xf32> -> vector<16x128xf32>
    %34 = arith.addf %30, %33 : vector<16x128xf32>
    %c1_33 = arith.constant 1 : index
    %c2_34 = arith.constant 2 : index
    %c0_35 = arith.constant 0 : index
    %35 = vector.load %arg0[%c1_33, %c2_34, %c0_35] : memref<2x18x64xf32, #tpu.memory_space<vmem>>, vector<1x16x64xf32>
    %36 = vector.shape_cast %35 : vector<1x16x64xf32> to vector<16x64xf32>
    %cst_36 = arith.constant dense<0.000000e+00> : vector<16x128xf32>
    %37 = tpu.matmul %36, %7, %cst_36 {dimension_numbers = #tpu.dot_dimension_numbers<[1], [0], [0], [1], [0, 0, 1, 1], [], []>} : vector<16x64xf32>, vector<64x128xf32>, vector<16x128xf32> -> vector<16x128xf32>
    %38 = arith.addf %34, %37 : vector<16x128xf32>
    %cst_37 = arith.constant dense<0.000000e+00> : vector<128xf32>
    %39 = vector.multi_reduction <add>, %38, %cst_37 [0] : vector<16x128xf32> to vector<128xf32>
    %40 = vector.shape_cast %39 : vector<128xf32> to vector<1x128xf32>
    %41 = arith.addf %23, %40 : vector<1x128xf32>
    %42 = arith.mulf %38, %38 : vector<16x128xf32>
    %cst_38 = arith.constant dense<0.000000e+00> : vector<128xf32>
    %43 = vector.multi_reduction <add>, %42, %cst_38 [0] : vector<16x128xf32> to vector<128xf32>
    %44 = vector.shape_cast %43 : vector<128xf32> to vector<1x128xf32>
    %45 = arith.addf %27, %44 : vector<1x128xf32>
    %cst_39 = arith.constant dense<0.000000e+00> : vector<1x128xf32>
    %46 = tpu.matmul %41, %0, %cst_39 {dimension_numbers = #tpu.dot_dimension_numbers<[1], [0], [0], [1], [0, 0, 1, 1], [], []>} : vector<1x128xf32>, vector<128x128xf32>, vector<1x128xf32> -> vector<1x128xf32>
    %cst_40 = arith.constant 0.001953125 : f32
    %47 = vector.broadcast %cst_40 : f32 to vector<1x128xf32>
    %48 = arith.mulf %46, %47 : vector<1x128xf32>
    %cst_41 = arith.constant dense<0.000000e+00> : vector<1x128xf32>
    %49 = tpu.matmul %45, %0, %cst_41 {dimension_numbers = #tpu.dot_dimension_numbers<[1], [0], [0], [1], [0, 0, 1, 1], [], []>} : vector<1x128xf32>, vector<128x128xf32>, vector<1x128xf32> -> vector<1x128xf32>
    %cst_42 = arith.constant 0.001953125 : f32
    %50 = vector.broadcast %cst_42 : f32 to vector<1x128xf32>
    %51 = arith.mulf %49, %50 : vector<1x128xf32>
    %52 = arith.mulf %48, %48 : vector<1x128xf32>
    %53 = arith.subf %51, %52 : vector<1x128xf32>
    %54 = vector.extract_strided_slice %1 {offsets = [0, 0], sizes = [1, 128], strides = [1, 1]} : vector<4x128xf32> to vector<1x128xf32>
    %cst_43 = arith.constant 9.99999974E-6 : f32
    %55 = vector.broadcast %cst_43 : f32 to vector<1x128xf32>
    %56 = arith.addf %53, %55 : vector<1x128xf32>
    %57 = math.rsqrt %56 : vector<1x128xf32>
    %58 = arith.mulf %54, %57 : vector<1x128xf32>
    %59 = vector.extract_strided_slice %1 {offsets = [1, 0], sizes = [1, 128], strides = [1, 1]} : vector<4x128xf32> to vector<1x128xf32>
    %60 = arith.mulf %48, %58 : vector<1x128xf32>
    %61 = arith.subf %59, %60 : vector<1x128xf32>
    %c0_44 = arith.constant 0 : index
    %c0_45 = arith.constant 0 : index
    %62 = vector.load %arg5[%c0_44, %c0_45] : memref<18x16xf32, #tpu.memory_space<vmem>>, vector<18x16xf32>
    %63 = vector.broadcast %58 : vector<1x128xf32> to vector<16x128xf32>
    %64 = arith.mulf %20, %63 : vector<16x128xf32>
    %65 = vector.broadcast %61 : vector<1x128xf32> to vector<16x128xf32>
    %66 = arith.addf %64, %65 : vector<16x128xf32>
    %cst_46 = arith.constant 5.000000e-01 : f32
    %67 = vector.broadcast %cst_46 : f32 to vector<16x128xf32>
    %68 = arith.mulf %67, %66 : vector<16x128xf32>
    %cst_47 = arith.constant 0.707106769 : f32
    %69 = vector.broadcast %cst_47 : f32 to vector<16x128xf32>
    %70 = arith.mulf %66, %69 : vector<16x128xf32>
    %cst_48 = arith.constant 0.000000e+00 : f32
    %71 = vector.broadcast %cst_48 : f32 to vector<16x128xf32>
    %72 = arith.cmpf oge, %70, %71 : vector<16x128xf32>
    %cst_49 = arith.constant 1.000000e+00 : f32
    %cst_50 = arith.constant -1.000000e+00 : f32
    %73 = vector.broadcast %cst_49 : f32 to vector<16x128xf32>
    %74 = vector.broadcast %cst_50 : f32 to vector<16x128xf32>
    %75 = arith.select %72, %73, %74 : vector<16x128xi1>, vector<16x128xf32>
    %76 = math.absf %70 : vector<16x128xf32>
    %cst_51 = arith.constant 0.327591091 : f32
    %77 = vector.broadcast %cst_51 : f32 to vector<16x128xf32>
    %78 = arith.mulf %77, %76 : vector<16x128xf32>
    %cst_52 = arith.constant 1.000000e+00 : f32
    %79 = vector.broadcast %cst_52 : f32 to vector<16x128xf32>
    %80 = arith.addf %79, %78 : vector<16x128xf32>
    %cst_53 = arith.constant 1.000000e+00 : f32
    %81 = vector.broadcast %cst_53 : f32 to vector<16x128xf32>
    %82 = arith.divf %81, %80 : vector<16x128xf32>
    %cst_54 = arith.constant 1.06140542 : f32
    %83 = vector.broadcast %cst_54 : f32 to vector<16x128xf32>
    %84 = arith.mulf %82, %83 : vector<16x128xf32>
    %cst_55 = arith.constant -1.45315206 : f32
    %85 = vector.broadcast %cst_55 : f32 to vector<16x128xf32>
    %86 = arith.addf %85, %84 : vector<16x128xf32>
    %87 = arith.mulf %82, %86 : vector<16x128xf32>
    %cst_56 = arith.constant 1.42141378 : f32
    %88 = vector.broadcast %cst_56 : f32 to vector<16x128xf32>
    %89 = arith.addf %88, %87 : vector<16x128xf32>
    %90 = arith.mulf %82, %89 : vector<16x128xf32>
    %cst_57 = arith.constant -0.284496725 : f32
    %91 = vector.broadcast %cst_57 : f32 to vector<16x128xf32>
    %92 = arith.addf %91, %90 : vector<16x128xf32>
    %93 = arith.mulf %82, %92 : vector<16x128xf32>
    %cst_58 = arith.constant 0.254829586 : f32
    %94 = vector.broadcast %cst_58 : f32 to vector<16x128xf32>
    %95 = arith.addf %94, %93 : vector<16x128xf32>
    %96 = arith.mulf %82, %95 : vector<16x128xf32>
    %cst_59 = arith.constant 0.000000e+00 : f32
    %97 = vector.broadcast %cst_59 : f32 to vector<16x128xf32>
    %98 = arith.subf %97, %76 : vector<16x128xf32>
    %99 = arith.mulf %98, %76 : vector<16x128xf32>
    %100 = math.exp %99 : vector<16x128xf32>
    %101 = arith.mulf %96, %100 : vector<16x128xf32>
    %cst_60 = arith.constant 1.000000e+00 : f32
    %102 = vector.broadcast %cst_60 : f32 to vector<16x128xf32>
    %103 = arith.subf %102, %101 : vector<16x128xf32>
    %104 = arith.mulf %75, %103 : vector<16x128xf32>
    %cst_61 = arith.constant 1.000000e+00 : f32
    %105 = vector.broadcast %cst_61 : f32 to vector<16x128xf32>
    %106 = arith.addf %105, %104 : vector<16x128xf32>
    %107 = arith.mulf %68, %106 : vector<16x128xf32>
    %cst_62 = arith.constant dense<0.000000e+00> : vector<18x128xf32>
    %108 = tpu.matmul %62, %107, %cst_62 {dimension_numbers = #tpu.dot_dimension_numbers<[1], [0], [0], [1], [0, 0, 1, 1], [], []>} : vector<18x16xf32>, vector<16x128xf32>, vector<18x128xf32> -> vector<18x128xf32>
    %c0_63 = arith.constant 0 : index
    %c0_64 = arith.constant 0 : index
    %c0_65 = arith.constant 0 : index
    %109 = vector.load %arg11[%c0_63, %c0_64, %c0_65] : memref<2x18x128xf32, #tpu.memory_space<vmem>>, vector<1x18x128xf32>
    %110 = vector.shape_cast %109 : vector<1x18x128xf32> to vector<18x128xf32>
    %111 = vector.shape_cast %108 : vector<18x128xf32> to vector<1x18x128xf32>
    tpu.vector_store %arg11[%c0_63, %c0_64, %c0_65], %111 {strides = array<i32>} : memref<2x18x128xf32, #tpu.memory_space<vmem>>, vector<1x18x128xf32>,
    %112 = vector.broadcast %58 : vector<1x128xf32> to vector<16x128xf32>
    %113 = arith.mulf %38, %112 : vector<16x128xf32>
    %114 = vector.broadcast %61 : vector<1x128xf32> to vector<16x128xf32>
    %115 = arith.addf %113, %114 : vector<16x128xf32>
    %cst_66 = arith.constant 5.000000e-01 : f32
    %116 = vector.broadcast %cst_66 : f32 to vector<16x128xf32>
    %117 = arith.mulf %116, %115 : vector<16x128xf32>
    %cst_67 = arith.constant 0.707106769 : f32
    %118 = vector.broadcast %cst_67 : f32 to vector<16x128xf32>
    %119 = arith.mulf %115, %118 : vector<16x128xf32>
    %cst_68 = arith.constant 0.000000e+00 : f32
    %120 = vector.broadcast %cst_68 : f32 to vector<16x128xf32>
    %121 = arith.cmpf oge, %119, %120 : vector<16x128xf32>
    %cst_69 = arith.constant 1.000000e+00 : f32
    %cst_70 = arith.constant -1.000000e+00 : f32
    %122 = vector.broadcast %cst_69 : f32 to vector<16x128xf32>
    %123 = vector.broadcast %cst_70 : f32 to vector<16x128xf32>
    %124 = arith.select %121, %122, %123 : vector<16x128xi1>, vector<16x128xf32>
    %125 = math.absf %119 : vector<16x128xf32>
    %cst_71 = arith.constant 0.327591091 : f32
    %126 = vector.broadcast %cst_71 : f32 to vector<16x128xf32>
    %127 = arith.mulf %126, %125 : vector<16x128xf32>
    %cst_72 = arith.constant 1.000000e+00 : f32
    %128 = vector.broadcast %cst_72 : f32 to vector<16x128xf32>
    %129 = arith.addf %128, %127 : vector<16x128xf32>
    %cst_73 = arith.constant 1.000000e+00 : f32
    %130 = vector.broadcast %cst_73 : f32 to vector<16x128xf32>
    %131 = arith.divf %130, %129 : vector<16x128xf32>
    %cst_74 = arith.constant 1.06140542 : f32
    %132 = vector.broadcast %cst_74 : f32 to vector<16x128xf32>
    %133 = arith.mulf %131, %132 : vector<16x128xf32>
    %cst_75 = arith.constant -1.45315206 : f32
    %134 = vector.broadcast %cst_75 : f32 to vector<16x128xf32>
    %135 = arith.addf %134, %133 : vector<16x128xf32>
    %136 = arith.mulf %131, %135 : vector<16x128xf32>
    %cst_76 = arith.constant 1.42141378 : f32
    %137 = vector.broadcast %cst_76 : f32 to vector<16x128xf32>
    %138 = arith.addf %137, %136 : vector<16x128xf32>
    %139 = arith.mulf %131, %138 : vector<16x128xf32>
    %cst_77 = arith.constant -0.284496725 : f32
    %140 = vector.broadcast %cst_77 : f32 to vector<16x128xf32>
    %141 = arith.addf %140, %139 : vector<16x128xf32>
    %142 = arith.mulf %131, %141 : vector<16x128xf32>
    %cst_78 = arith.constant 0.254829586 : f32
    %143 = vector.broadcast %cst_78 : f32 to vector<16x128xf32>
    %144 = arith.addf %143, %142 : vector<16x128xf32>
    %145 = arith.mulf %131, %144 : vector<16x128xf32>
    %cst_79 = arith.constant 0.000000e+00 : f32
    %146 = vector.broadcast %cst_79 : f32 to vector<16x128xf32>
    %147 = arith.subf %146, %125 : vector<16x128xf32>
    %148 = arith.mulf %147, %125 : vector<16x128xf32>
    %149 = math.exp %148 : vector<16x128xf32>
    %150 = arith.mulf %145, %149 : vector<16x128xf32>
    %cst_80 = arith.constant 1.000000e+00 : f32
    %151 = vector.broadcast %cst_80 : f32 to vector<16x128xf32>
    %152 = arith.subf %151, %150 : vector<16x128xf32>
    %153 = arith.mulf %124, %152 : vector<16x128xf32>
    %cst_81 = arith.constant 1.000000e+00 : f32
    %154 = vector.broadcast %cst_81 : f32 to vector<16x128xf32>
    %155 = arith.addf %154, %153 : vector<16x128xf32>
    %156 = arith.mulf %117, %155 : vector<16x128xf32>
    %cst_82 = arith.constant dense<0.000000e+00> : vector<18x128xf32>
    %157 = tpu.matmul %62, %156, %cst_82 {dimension_numbers = #tpu.dot_dimension_numbers<[1], [0], [0], [1], [0, 0, 1, 1], [], []>} : vector<18x16xf32>, vector<16x128xf32>, vector<18x128xf32> -> vector<18x128xf32>
    %c1_83 = arith.constant 1 : index
    %c0_84 = arith.constant 0 : index
    %c0_85 = arith.constant 0 : index
    %158 = vector.load %arg11[%c1_83, %c0_84, %c0_85] : memref<2x18x128xf32, #tpu.memory_space<vmem>>, vector<1x18x128xf32>
    %159 = vector.shape_cast %158 : vector<1x18x128xf32> to vector<18x128xf32>
    %160 = vector.shape_cast %157 : vector<18x128xf32> to vector<1x18x128xf32>
    tpu.vector_store %arg11[%c1_83, %c0_84, %c0_85], %160 {strides = array<i32>} : memref<2x18x128xf32, #tpu.memory_space<vmem>>, vector<1x18x128xf32>,
    %c0_86 = arith.constant 0 : index
    %c0_87 = arith.constant 0 : index
    %c0_88 = arith.constant 0 : index
    %161 = vector.load %arg2[%c0_86, %c0_87, %c0_88] : memref<3x128x128xf32, #tpu.memory_space<vmem>>, vector<1x128x128xf32>
    %162 = vector.shape_cast %161 : vector<1x128x128xf32> to vector<128x128xf32>
    %c1_89 = arith.constant 1 : index
    %c0_90 = arith.constant 0 : index
    %c0_91 = arith.constant 0 : index
    %163 = vector.load %arg2[%c1_89, %c0_90, %c0_91] : memref<3x128x128xf32, #tpu.memory_space<vmem>>, vector<1x128x128xf32>
    %164 = vector.shape_cast %163 : vector<1x128x128xf32> to vector<128x128xf32>
    %c2_92 = arith.constant 2 : index
    %c0_93 = arith.constant 0 : index
    %c0_94 = arith.constant 0 : index
    %165 = vector.load %arg2[%c2_92, %c0_93, %c0_94] : memref<3x128x128xf32, #tpu.memory_space<vmem>>, vector<1x128x128xf32>
    %166 = vector.shape_cast %165 : vector<1x128x128xf32> to vector<128x128xf32>
    %cst_95 = arith.constant 0.000000e+00 : f32
    %167 = vector.broadcast %cst_95 : f32 to vector<1x128xf32>
    %cst_96 = arith.constant 0.000000e+00 : f32
    %168 = vector.broadcast %cst_96 : f32 to vector<1x128xf32>
    %c0_97 = arith.constant 0 : index
    %c0_98 = arith.constant 0 : index
    %c0_99 = arith.constant 0 : index
    %169 = vector.load %arg11[%c0_97, %c0_98, %c0_99] : memref<2x18x128xf32, #tpu.memory_space<vmem>>, vector<1x16x128xf32>
    %170 = vector.shape_cast %169 : vector<1x16x128xf32> to vector<16x128xf32>
    %cst_100 = arith.constant dense<0.000000e+00> : vector<16x128xf32>
    %171 = tpu.matmul %170, %162, %cst_100 {dimension_numbers = #tpu.dot_dimension_numbers<[1], [0], [0], [1], [0, 0, 1, 1], [], []>} : vector<16x128xf32>, vector<128x128xf32>, vector<16x128xf32> -> vector<16x128xf32>
    %c0_101 = arith.constant 0 : index
    %c1_102 = arith.constant 1 : index
    %c0_103 = arith.constant 0 : index
    %172 = vector.load %arg11[%c0_101, %c1_102, %c0_103] : memref<2x18x128xf32, #tpu.memory_space<vmem>>, vector<1x16x128xf32>
    %173 = vector.shape_cast %172 : vector<1x16x128xf32> to vector<16x128xf32>
    %cst_104 = arith.constant dense<0.000000e+00> : vector<16x128xf32>
    %174 = tpu.matmul %173, %164, %cst_104 {dimension_numbers = #tpu.dot_dimension_numbers<[1], [0], [0], [1], [0, 0, 1, 1], [], []>} : vector<16x128xf32>, vector<128x128xf32>, vector<16x128xf32> -> vector<16x128xf32>
    %175 = arith.addf %171, %174 : vector<16x128xf32>
    %c0_105 = arith.constant 0 : index
    %c2_106 = arith.constant 2 : index
    %c0_107 = arith.constant 0 : index
    %176 = vector.load %arg11[%c0_105, %c2_106, %c0_107] : memref<2x18x128xf32, #tpu.memory_space<vmem>>, vector<1x16x128xf32>
    %177 = vector.shape_cast %176 : vector<1x16x128xf32> to vector<16x128xf32>
    %cst_108 = arith.constant dense<0.000000e+00> : vector<16x128xf32>
    %178 = tpu.matmul %177, %166, %cst_108 {dimension_numbers = #tpu.dot_dimension_numbers<[1], [0], [0], [1], [0, 0, 1, 1], [], []>} : vector<16x128xf32>, vector<128x128xf32>, vector<16x128xf32> -> vector<16x128xf32>
    %179 = arith.addf %175, %178 : vector<16x128xf32>
    %cst_109 = arith.constant dense<0.000000e+00> : vector<128xf32>
    %180 = vector.multi_reduction <add>, %179, %cst_109 [0] : vector<16x128xf32> to vector<128xf32>
    %181 = vector.shape_cast %180 : vector<128xf32> to vector<1x128xf32>
    %182 = arith.addf %167, %181 : vector<1x128xf32>
    %183 = arith.mulf %179, %179 : vector<16x128xf32>
    %cst_110 = arith.constant dense<0.000000e+00> : vector<128xf32>
    %184 = vector.multi_reduction <add>, %183, %cst_110 [0] : vector<16x128xf32> to vector<128xf32>
    %185 = vector.shape_cast %184 : vector<128xf32> to vector<1x128xf32>
    %186 = arith.addf %168, %185 : vector<1x128xf32>
    %c1_111 = arith.constant 1 : index
    %c0_112 = arith.constant 0 : index
    %c0_113 = arith.constant 0 : index
    %187 = vector.load %arg11[%c1_111, %c0_112, %c0_113] : memref<2x18x128xf32, #tpu.memory_space<vmem>>, vector<1x16x128xf32>
    %188 = vector.shape_cast %187 : vector<1x16x128xf32> to vector<16x128xf32>
    %cst_114 = arith.constant dense<0.000000e+00> : vector<16x128xf32>
    %189 = tpu.matmul %188, %162, %cst_114 {dimension_numbers = #tpu.dot_dimension_numbers<[1], [0], [0], [1], [0, 0, 1, 1], [], []>} : vector<16x128xf32>, vector<128x128xf32>, vector<16x128xf32> -> vector<16x128xf32>
    %c1_115 = arith.constant 1 : index
    %c1_116 = arith.constant 1 : index
    %c0_117 = arith.constant 0 : index
    %190 = vector.load %arg11[%c1_115, %c1_116, %c0_117] : memref<2x18x128xf32, #tpu.memory_space<vmem>>, vector<1x16x128xf32>
    %191 = vector.shape_cast %190 : vector<1x16x128xf32> to vector<16x128xf32>
    %cst_118 = arith.constant dense<0.000000e+00> : vector<16x128xf32>
    %192 = tpu.matmul %191, %164, %cst_118 {dimension_numbers = #tpu.dot_dimension_numbers<[1], [0], [0], [1], [0, 0, 1, 1], [], []>} : vector<16x128xf32>, vector<128x128xf32>, vector<16x128xf32> -> vector<16x128xf32>
    %193 = arith.addf %189, %192 : vector<16x128xf32>
    %c1_119 = arith.constant 1 : index
    %c2_120 = arith.constant 2 : index
    %c0_121 = arith.constant 0 : index
    %194 = vector.load %arg11[%c1_119, %c2_120, %c0_121] : memref<2x18x128xf32, #tpu.memory_space<vmem>>, vector<1x16x128xf32>
    %195 = vector.shape_cast %194 : vector<1x16x128xf32> to vector<16x128xf32>
    %cst_122 = arith.constant dense<0.000000e+00> : vector<16x128xf32>
    %196 = tpu.matmul %195, %166, %cst_122 {dimension_numbers = #tpu.dot_dimension_numbers<[1], [0], [0], [1], [0, 0, 1, 1], [], []>} : vector<16x128xf32>, vector<128x128xf32>, vector<16x128xf32> -> vector<16x128xf32>
    %197 = arith.addf %193, %196 : vector<16x128xf32>
    %cst_123 = arith.constant dense<0.000000e+00> : vector<128xf32>
    %198 = vector.multi_reduction <add>, %197, %cst_123 [0] : vector<16x128xf32> to vector<128xf32>
    %199 = vector.shape_cast %198 : vector<128xf32> to vector<1x128xf32>
    %200 = arith.addf %182, %199 : vector<1x128xf32>
    %201 = arith.mulf %197, %197 : vector<16x128xf32>
    %cst_124 = arith.constant dense<0.000000e+00> : vector<128xf32>
    %202 = vector.multi_reduction <add>, %201, %cst_124 [0] : vector<16x128xf32> to vector<128xf32>
    %203 = vector.shape_cast %202 : vector<128xf32> to vector<1x128xf32>
    %204 = arith.addf %186, %203 : vector<1x128xf32>
    %cst_125 = arith.constant dense<0.000000e+00> : vector<1x128xf32>
    %205 = tpu.matmul %200, %0, %cst_125 {dimension_numbers = #tpu.dot_dimension_numbers<[1], [0], [0], [1], [0, 0, 1, 1], [], []>} : vector<1x128xf32>, vector<128x128xf32>, vector<1x128xf32> -> vector<1x128xf32>
    %cst_126 = arith.constant 0.001953125 : f32
    %206 = vector.broadcast %cst_126 : f32 to vector<1x128xf32>
    %207 = arith.mulf %205, %206 : vector<1x128xf32>
    %cst_127 = arith.constant dense<0.000000e+00> : vector<1x128xf32>
    %208 = tpu.matmul %204, %0, %cst_127 {dimension_numbers = #tpu.dot_dimension_numbers<[1], [0], [0], [1], [0, 0, 1, 1], [], []>} : vector<1x128xf32>, vector<128x128xf32>, vector<1x128xf32> -> vector<1x128xf32>
    %cst_128 = arith.constant 0.001953125 : f32
    %209 = vector.broadcast %cst_128 : f32 to vector<1x128xf32>
    %210 = arith.mulf %208, %209 : vector<1x128xf32>
    %211 = arith.mulf %207, %207 : vector<1x128xf32>
    %212 = arith.subf %210, %211 : vector<1x128xf32>
    %213 = vector.extract_strided_slice %1 {offsets = [2, 0], sizes = [1, 128], strides = [1, 1]} : vector<4x128xf32> to vector<1x128xf32>
    %cst_129 = arith.constant 9.99999974E-6 : f32
    %214 = vector.broadcast %cst_129 : f32 to vector<1x128xf32>
    %215 = arith.addf %212, %214 : vector<1x128xf32>
    %216 = math.rsqrt %215 : vector<1x128xf32>
    %217 = arith.mulf %213, %216 : vector<1x128xf32>
    %218 = vector.extract_strided_slice %1 {offsets = [3, 0], sizes = [1, 128], strides = [1, 1]} : vector<4x128xf32> to vector<1x128xf32>
    %219 = arith.mulf %207, %217 : vector<1x128xf32>
    %220 = arith.subf %218, %219 : vector<1x128xf32>
    %c0_130 = arith.constant 0 : index
    %c0_131 = arith.constant 0 : index
    %221 = vector.load %arg6[%c0_130, %c0_131] : memref<8x16xf32, #tpu.memory_space<vmem>>, vector<8x16xf32>
    %c0_132 = arith.constant 0 : index
    %c0_133 = arith.constant 0 : index
    %222 = vector.load %arg7[%c0_132, %c0_133] : memref<8x16xf32, #tpu.memory_space<vmem>>, vector<8x16xf32>
    %c0_134 = arith.constant 0 : index
    %c0_135 = arith.constant 0 : index
    %223 = vector.load %arg8[%c0_134, %c0_135] : memref<128x64xf32, #tpu.memory_space<vmem>>, vector<128x64xf32>
    %c0_136 = arith.constant 0 : index
    %c0_137 = arith.constant 0 : index
    %224 = vector.load %arg9[%c0_136, %c0_137] : memref<128x64xf32, #tpu.memory_space<vmem>>, vector<128x64xf32>
    %225 = vector.broadcast %217 : vector<1x128xf32> to vector<16x128xf32>
    %226 = arith.mulf %179, %225 : vector<16x128xf32>
    %227 = vector.broadcast %220 : vector<1x128xf32> to vector<16x128xf32>
    %228 = arith.addf %226, %227 : vector<16x128xf32>
    %cst_138 = arith.constant 5.000000e-01 : f32
    %229 = vector.broadcast %cst_138 : f32 to vector<16x128xf32>
    %230 = arith.mulf %229, %228 : vector<16x128xf32>
    %cst_139 = arith.constant 0.707106769 : f32
    %231 = vector.broadcast %cst_139 : f32 to vector<16x128xf32>
    %232 = arith.mulf %228, %231 : vector<16x128xf32>
    %cst_140 = arith.constant 0.000000e+00 : f32
    %233 = vector.broadcast %cst_140 : f32 to vector<16x128xf32>
    %234 = arith.cmpf oge, %232, %233 : vector<16x128xf32>
    %cst_141 = arith.constant 1.000000e+00 : f32
    %cst_142 = arith.constant -1.000000e+00 : f32
    %235 = vector.broadcast %cst_141 : f32 to vector<16x128xf32>
    %236 = vector.broadcast %cst_142 : f32 to vector<16x128xf32>
    %237 = arith.select %234, %235, %236 : vector<16x128xi1>, vector<16x128xf32>
    %238 = math.absf %232 : vector<16x128xf32>
    %cst_143 = arith.constant 0.327591091 : f32
    %239 = vector.broadcast %cst_143 : f32 to vector<16x128xf32>
    %240 = arith.mulf %239, %238 : vector<16x128xf32>
    %cst_144 = arith.constant 1.000000e+00 : f32
    %241 = vector.broadcast %cst_144 : f32 to vector<16x128xf32>
    %242 = arith.addf %241, %240 : vector<16x128xf32>
    %cst_145 = arith.constant 1.000000e+00 : f32
    %243 = vector.broadcast %cst_145 : f32 to vector<16x128xf32>
    %244 = arith.divf %243, %242 : vector<16x128xf32>
    %cst_146 = arith.constant 1.06140542 : f32
    %245 = vector.broadcast %cst_146 : f32 to vector<16x128xf32>
    %246 = arith.mulf %244, %245 : vector<16x128xf32>
    %cst_147 = arith.constant -1.45315206 : f32
    %247 = vector.broadcast %cst_147 : f32 to vector<16x128xf32>
    %248 = arith.addf %247, %246 : vector<16x128xf32>
    %249 = arith.mulf %244, %248 : vector<16x128xf32>
    %cst_148 = arith.constant 1.42141378 : f32
    %250 = vector.broadcast %cst_148 : f32 to vector<16x128xf32>
    %251 = arith.addf %250, %249 : vector<16x128xf32>
    %252 = arith.mulf %244, %251 : vector<16x128xf32>
    %cst_149 = arith.constant -0.284496725 : f32
    %253 = vector.broadcast %cst_149 : f32 to vector<16x128xf32>
    %254 = arith.addf %253, %252 : vector<16x128xf32>
    %255 = arith.mulf %244, %254 : vector<16x128xf32>
    %cst_150 = arith.constant 0.254829586 : f32
    %256 = vector.broadcast %cst_150 : f32 to vector<16x128xf32>
    %257 = arith.addf %256, %255 : vector<16x128xf32>
    %258 = arith.mulf %244, %257 : vector<16x128xf32>
    %cst_151 = arith.constant 0.000000e+00 : f32
    %259 = vector.broadcast %cst_151 : f32 to vector<16x128xf32>
    %260 = arith.subf %259, %238 : vector<16x128xf32>
    %261 = arith.mulf %260, %238 : vector<16x128xf32>
    %262 = math.exp %261 : vector<16x128xf32>
    %263 = arith.mulf %258, %262 : vector<16x128xf32>
    %cst_152 = arith.constant 1.000000e+00 : f32
    %264 = vector.broadcast %cst_152 : f32 to vector<16x128xf32>
    %265 = arith.subf %264, %263 : vector<16x128xf32>
    %266 = arith.mulf %237, %265 : vector<16x128xf32>
    %cst_153 = arith.constant 1.000000e+00 : f32
    %267 = vector.broadcast %cst_153 : f32 to vector<16x128xf32>
    %268 = arith.addf %267, %266 : vector<16x128xf32>
    %269 = arith.mulf %230, %268 : vector<16x128xf32>
    %cst_154 = arith.constant dense<0.000000e+00> : vector<8x128xf32>
    %270 = tpu.matmul %221, %269, %cst_154 {dimension_numbers = #tpu.dot_dimension_numbers<[1], [0], [0], [1], [0, 0, 1, 1], [], []>} : vector<8x16xf32>, vector<16x128xf32>, vector<8x128xf32> -> vector<8x128xf32>
    %cst_155 = arith.constant dense<0.000000e+00> : vector<8x128xf32>
    %271 = tpu.matmul %222, %269, %cst_155 {dimension_numbers = #tpu.dot_dimension_numbers<[1], [0], [0], [1], [0, 0, 1, 1], [], []>} : vector<8x16xf32>, vector<16x128xf32>, vector<8x128xf32> -> vector<8x128xf32>
    %272 = arith.maximumf %270, %271 : vector<8x128xf32>
    %cst_156 = arith.constant dense<0.000000e+00> : vector<8x64xf32>
    %273 = tpu.matmul %272, %223, %cst_156 {dimension_numbers = #tpu.dot_dimension_numbers<[1], [0], [0], [1], [0, 0, 1, 1], [], []>} : vector<8x128xf32>, vector<128x64xf32>, vector<8x64xf32> -> vector<8x64xf32>
    %cst_157 = arith.constant dense<0.000000e+00> : vector<8x64xf32>
    %274 = tpu.matmul %272, %224, %cst_157 {dimension_numbers = #tpu.dot_dimension_numbers<[1], [0], [0], [1], [0, 0, 1, 1], [], []>} : vector<8x128xf32>, vector<128x64xf32>, vector<8x64xf32> -> vector<8x64xf32>
    %275 = arith.maximumf %273, %274 : vector<8x64xf32>
    %c0_158 = arith.constant 0 : index
    %c0_159 = arith.constant 0 : index
    %c0_160 = arith.constant 0 : index
    %276 = vector.load %arg10[%c0_158, %c0_159, %c0_160] : memref<2x8x64xf32, #tpu.memory_space<vmem>>, vector<1x8x64xf32>
    %277 = vector.shape_cast %276 : vector<1x8x64xf32> to vector<8x64xf32>
    %278 = vector.shape_cast %275 : vector<8x64xf32> to vector<1x8x64xf32>
    tpu.vector_store %arg10[%c0_158, %c0_159, %c0_160], %278 {strides = array<i32>} : memref<2x8x64xf32, #tpu.memory_space<vmem>>, vector<1x8x64xf32>,
    %279 = vector.broadcast %217 : vector<1x128xf32> to vector<16x128xf32>
    %280 = arith.mulf %197, %279 : vector<16x128xf32>
    %281 = vector.broadcast %220 : vector<1x128xf32> to vector<16x128xf32>
    %282 = arith.addf %280, %281 : vector<16x128xf32>
    %cst_161 = arith.constant 5.000000e-01 : f32
    %283 = vector.broadcast %cst_161 : f32 to vector<16x128xf32>
    %284 = arith.mulf %283, %282 : vector<16x128xf32>
    %cst_162 = arith.constant 0.707106769 : f32
    %285 = vector.broadcast %cst_162 : f32 to vector<16x128xf32>
    %286 = arith.mulf %282, %285 : vector<16x128xf32>
    %cst_163 = arith.constant 0.000000e+00 : f32
    %287 = vector.broadcast %cst_163 : f32 to vector<16x128xf32>
    %288 = arith.cmpf oge, %286, %287 : vector<16x128xf32>
    %cst_164 = arith.constant 1.000000e+00 : f32
    %cst_165 = arith.constant -1.000000e+00 : f32
    %289 = vector.broadcast %cst_164 : f32 to vector<16x128xf32>
    %290 = vector.broadcast %cst_165 : f32 to vector<16x128xf32>
    %291 = arith.select %288, %289, %290 : vector<16x128xi1>, vector<16x128xf32>
    %292 = math.absf %286 : vector<16x128xf32>
    %cst_166 = arith.constant 0.327591091 : f32
    %293 = vector.broadcast %cst_166 : f32 to vector<16x128xf32>
    %294 = arith.mulf %293, %292 : vector<16x128xf32>
    %cst_167 = arith.constant 1.000000e+00 : f32
    %295 = vector.broadcast %cst_167 : f32 to vector<16x128xf32>
    %296 = arith.addf %295, %294 : vector<16x128xf32>
    %cst_168 = arith.constant 1.000000e+00 : f32
    %297 = vector.broadcast %cst_168 : f32 to vector<16x128xf32>
    %298 = arith.divf %297, %296 : vector<16x128xf32>
    %cst_169 = arith.constant 1.06140542 : f32
    %299 = vector.broadcast %cst_169 : f32 to vector<16x128xf32>
    %300 = arith.mulf %298, %299 : vector<16x128xf32>
    %cst_170 = arith.constant -1.45315206 : f32
    %301 = vector.broadcast %cst_170 : f32 to vector<16x128xf32>
    %302 = arith.addf %301, %300 : vector<16x128xf32>
    %303 = arith.mulf %298, %302 : vector<16x128xf32>
    %cst_171 = arith.constant 1.42141378 : f32
    %304 = vector.broadcast %cst_171 : f32 to vector<16x128xf32>
    %305 = arith.addf %304, %303 : vector<16x128xf32>
    %306 = arith.mulf %298, %305 : vector<16x128xf32>
    %cst_172 = arith.constant -0.284496725 : f32
    %307 = vector.broadcast %cst_172 : f32 to vector<16x128xf32>
    %308 = arith.addf %307, %306 : vector<16x128xf32>
    %309 = arith.mulf %298, %308 : vector<16x128xf32>
    %cst_173 = arith.constant 0.254829586 : f32
    %310 = vector.broadcast %cst_173 : f32 to vector<16x128xf32>
    %311 = arith.addf %310, %309 : vector<16x128xf32>
    %312 = arith.mulf %298, %311 : vector<16x128xf32>
    %cst_174 = arith.constant 0.000000e+00 : f32
    %313 = vector.broadcast %cst_174 : f32 to vector<16x128xf32>
    %314 = arith.subf %313, %292 : vector<16x128xf32>
    %315 = arith.mulf %314, %292 : vector<16x128xf32>
    %316 = math.exp %315 : vector<16x128xf32>
    %317 = arith.mulf %312, %316 : vector<16x128xf32>
    %cst_175 = arith.constant 1.000000e+00 : f32
    %318 = vector.broadcast %cst_175 : f32 to vector<16x128xf32>
    %319 = arith.subf %318, %317 : vector<16x128xf32>
    %320 = arith.mulf %291, %319 : vector<16x128xf32>
    %cst_176 = arith.constant 1.000000e+00 : f32
    %321 = vector.broadcast %cst_176 : f32 to vector<16x128xf32>
    %322 = arith.addf %321, %320 : vector<16x128xf32>
    %323 = arith.mulf %284, %322 : vector<16x128xf32>
    %cst_177 = arith.constant dense<0.000000e+00> : vector<8x128xf32>
    %324 = tpu.matmul %221, %323, %cst_177 {dimension_numbers = #tpu.dot_dimension_numbers<[1], [0], [0], [1], [0, 0, 1, 1], [], []>} : vector<8x16xf32>, vector<16x128xf32>, vector<8x128xf32> -> vector<8x128xf32>
    %cst_178 = arith.constant dense<0.000000e+00> : vector<8x128xf32>
    %325 = tpu.matmul %222, %323, %cst_178 {dimension_numbers = #tpu.dot_dimension_numbers<[1], [0], [0], [1], [0, 0, 1, 1], [], []>} : vector<8x16xf32>, vector<16x128xf32>, vector<8x128xf32> -> vector<8x128xf32>
    %326 = arith.maximumf %324, %325 : vector<8x128xf32>
    %cst_179 = arith.constant dense<0.000000e+00> : vector<8x64xf32>
    %327 = tpu.matmul %326, %223, %cst_179 {dimension_numbers = #tpu.dot_dimension_numbers<[1], [0], [0], [1], [0, 0, 1, 1], [], []>} : vector<8x128xf32>, vector<128x64xf32>, vector<8x64xf32> -> vector<8x64xf32>
    %cst_180 = arith.constant dense<0.000000e+00> : vector<8x64xf32>
    %328 = tpu.matmul %326, %224, %cst_180 {dimension_numbers = #tpu.dot_dimension_numbers<[1], [0], [0], [1], [0, 0, 1, 1], [], []>} : vector<8x128xf32>, vector<128x64xf32>, vector<8x64xf32> -> vector<8x64xf32>
    %329 = arith.maximumf %327, %328 : vector<8x64xf32>
    %c1_181 = arith.constant 1 : index
    %c0_182 = arith.constant 0 : index
    %c0_183 = arith.constant 0 : index
    %330 = vector.load %arg10[%c1_181, %c0_182, %c0_183] : memref<2x8x64xf32, #tpu.memory_space<vmem>>, vector<1x8x64xf32>
    %331 = vector.shape_cast %330 : vector<1x8x64xf32> to vector<8x64xf32>
    %332 = vector.shape_cast %329 : vector<8x64xf32> to vector<1x8x64xf32>
    tpu.vector_store %arg10[%c1_181, %c0_182, %c0_183], %332 {strides = array<i32>} : memref<2x8x64xf32, #tpu.memory_space<vmem>>, vector<1x8x64xf32>,
    return
  }
}

</mosaic_0001>

<bundles_post_ra>
// kernel: tile.23
= control target key start
LH: loop header
LB: loop body
LE: loop exit
PB: predicated region body
PF: predicated region fallthrough
CT: control target
= control target key end

     0   :  { %s28_s0 = inlined_call_operand.vmem [shape: f32[8], index: 0, kind: input, shape index: {}]   ;;  %s29_s1 = inlined_call_operand.vmem [shape: f32[16,8], index: 1, kind: output, shape index: {}]  }
   0x1   :  { %v4_v0 = vld [vmem:[%s28_s0] ss:$0 sm:$0xff] }
   0x2   :  { %5 = vst [vmem:[%s29_s1] sm:$0xff] %v4_v0  ;;  %8 = vst [vmem:[%s29_s1 + $0x8] sm:$0xff] %v4_v0 }

// kernel: tile.36
= control target key start
LH: loop header
LB: loop body
LE: loop exit
PB: predicated region body
PF: predicated region fallthrough
CT: control target
= control target key end

     0   :  { %s133_s10 = smov 120   ;;  %s134_s11 = smov 104   ;;  %vm3_vm0 = vcmask 64512   ;;  %vm9_vm1 = vcmask 1048512   ;;  %vm15_vm2 = vcmask 982912   ;;  %vm21_vm3 = vcmask 917312   ;;  %s209_s0 = inlined_call_operand.vmem [shape: f32[16,8], index: 0, kind: input, shape index: {}]   ;;  %s210_s1 = inlined_call_operand.vmem [shape: f32[1,128], index: 1, kind: output, shape index: {}]  }
   0x1   :  { %v103_v0 = vld [vmem:[%s209_s0 + $0xf] sm:$0x1]   ;;  %v105_v1 = vld [vmem:[%s209_s0 + $0xd] sm:$0x1]   ;;  %v104_v2 = vld [vmem:[%s209_s0 + $0xe] sm:$0x1]  }
   0x2   :  { %7 = vrot.lane.b32.xlu0 %v103_v0, %s133_s10  ;;  %19 = vrot.lane.b32.xlu1 %v105_v1, %s134_s11  ;;  %v106_v3 = vld [vmem:[%s209_s0 + $0xc] sm:$0x1]   ;;  %s135_s16 = smov 112   ;;  %s136_s17 = smov 96   ;;  %v107_v4 = vld [vmem:[%s209_s0 + $0xb] sm:$0x1]  }
   0x3   :  { %v108_v5 = vld [vmem:[%s209_s0 + $0xa] sm:$0x1]   ;;  %v2_v6 = vld [vmem:[%s209_s0] sm:$0x1]   ;;  %s137_s24 = smov 88   ;;  %s138_s25 = smov 80  }
   0x4   :  { %4 = vst.msk [vmem:[#allocation0] sm:$0x1] %vm3_vm0, %v2_v6   ;;  %v109_v7 = vld [vmem:[%s209_s0 + $0x9] sm:$0x1]   ;;  %v110_v8 = vld [vmem:[%s209_s0 + $0x8] sm:$0x1]  }
   0x5   :  { %s139_s30 = smov 72   ;;  %s140_s2 = smov 64   ;;  %v111_v9 = vld [vmem:[%s209_s0 + $0x7] sm:$0x1]   ;;  %v112_v10 = vld [vmem:[%s209_s0 + $0x6] sm:$0x1]  }
   0x6   :  { %13 = vrot.lane.b32.xlu0 %v104_v2, %s135_s16  ;;  %25 = vrot.lane.b32.xlu1 %v106_v3, %s136_s17  ;;  %s141_s7 = smov 56   ;;  %s142_s8 = smov 48   ;;  %v113_v11 = vld [vmem:[%s209_s0 + $0x5] sm:$0x1]   ;;  %v114_v12 = vld [vmem:[%s209_s0 + $0x4] sm:$0x1]  }
   0x7   :  { %s143_s13 = smov 40   ;;  %s144_s14 = smov 32   ;;  %v115_v13 = vld [vmem:[%s209_s0 + $0x3] sm:$0x1]   ;;  %v116_v14 = vld [vmem:[%s209_s0 + $0x2] sm:$0x1]  }
   0x8   :  { %s145_s19 = smov 24   ;;  %s146_s20 = smov 16   ;;  %v117_v15 = vld [vmem:[%s209_s0 + $0x1] sm:$0x1]   ;;  %vm27_vm4 = vcmask 851712   ;;  %vm33_vm5 = vcmask 786112  }
   0x9   :  { %s147_s0 = smov 8   ;;  %vm39_vm6 = vcmask 720512   ;;  %vm45_vm7 = vcmask 654912   ;;  %vm51_vm8 = vcmask 589312   ;;  %vm57_vm9 = vcmask 523712  }
   0xa   :  { %31 = vrot.lane.b32.xlu0 %v107_v4, %s137_s24  ;;  %37 = vrot.lane.b32.xlu1 %v108_v5, %s138_s25  ;;  %vm63_vm10 = vcmask 458112   ;;  %vm69_vm11 = vcmask 392512   ;;  %vm75_vm12 = vcmask 326912   ;;  %vm81_vm13 = vcmask 261312  }
   0xb   :  { %vm87_vm14 = vcmask 195712   ;;  %vm93_vm15 = vcmask 130112  }
   0xe   :  { %43 = vrot.lane.b32.xlu0 %v109_v7, %s139_s30  ;;  %49 = vrot.lane.b32.xlu1 %v110_v8, %s140_s2 }
  0x12   :  { %55 = vrot.lane.b32.xlu0 %v111_v9, %s141_s7  ;;  %61 = vrot.lane.b32.xlu1 %v112_v10, %s142_s8 }
  0x16   :  { %67 = vrot.lane.b32.xlu0 %v113_v11, %s143_s13  ;;  %73 = vrot.lane.b32.xlu1 %v114_v12, %s144_s14 }
  0x1a   :  { %79 = vrot.lane.b32.xlu0 %v115_v13, %s145_s19  ;;  %85 = vrot.lane.b32.xlu1 %v116_v14, %s146_s20 }
  0x1e   :  { %91 = vrot.lane.b32.xlu0 %v117_v15, %s147_s0 }
  0x74   :  { %v8_v16 = vpop.permute.xlu0 %7   ;;  %v20_v17 = vpop.permute.xlu1 %19  }
  0x75   :  { %10 = vst.msk [vmem:[#allocation0] sm:$0x1] %vm9_vm1, %v8_v16  }
  0x78   :  { %v14_v18 = vpop.permute.xlu0 %13   ;;  %v26_v19 = vpop.permute.xlu1 %25  }
  0x79   :  { %16 = vst.msk [vmem:[#allocation0] sm:$0x1] %vm15_vm2, %v14_v18  }
  0x7a   :  { %22 = vst.msk [vmem:[#allocation0] sm:$0x1] %vm21_vm3, %v20_v17  }
  0x7b   :  { %28 = vst.msk [vmem:[#allocation0] sm:$0x1] %vm27_vm4, %v26_v19  }
  0x7c   :  { %v32_v20 = vpop.permute.xlu0 %31   ;;  %v38_v21 = vpop.permute.xlu1 %37  }
  0x7d   :  { %34 = vst.msk [vmem:[#allocation0] sm:$0x1] %vm33_vm5, %v32_v20  }
  0x7e   :  { %40 = vst.msk [vmem:[#allocation0] sm:$0x1] %vm39_vm6, %v38_v21  }
  0x80   :  { %v44_v22 = vpop.permute.xlu0 %43   ;;  %v50_v23 = vpop.permute.xlu1 %49  }
  0x81   :  { %46 = vst.msk [vmem:[#allocation0] sm:$0x1] %vm45_vm7, %v44_v22  }
  0x82   :  { %52 = vst.msk [vmem:[#allocation0] sm:$0x1] %vm51_vm8, %v50_v23  }
  0x84   :  { %v56_v24 = vpop.permute.xlu0 %55   ;;  %v62_v25 = vpop.permute.xlu1 %61  }
  0x85   :  { %58 = vst.msk [vmem:[#allocation0] sm:$0x1] %vm57_vm9, %v56_v24  }
  0x86   :  { %64 = vst.msk [vmem:[#allocation0] sm:$0x1] %vm63_vm10, %v62_v25  }
  0x88   :  { %v68_v26 = vpop.permute.xlu0 %67   ;;  %v74_v27 = vpop.permute.xlu1 %73  }
  0x89   :  { %70 = vst.msk [vmem:[#allocation0] sm:$0x1] %vm69_vm11, %v68_v26  }
  0x8a   :  { %76 = vst.msk [vmem:[#allocation0] sm:$0x1] %vm75_vm12, %v74_v27  }
  0x8c   :  { %v80_v28 = vpop.permute.xlu0 %79   ;;  %v86_v29 = vpop.permute.xlu1 %85  }
  0x8d   :  { %82 = vst.msk [vmem:[#allocation0] sm:$0x1] %vm81_vm13, %v80_v28  }
  0x8e   :  { %88 = vst.msk [vmem:[#allocation0] sm:$0x1] %vm87_vm14, %v86_v29  }
  0x90   :  { %v92_v30 = vpop.permute.xlu0 %91  }
  0x91   :  { %94 = vst.msk [vmem:[#allocation0] sm:$0x1] %vm93_vm15, %v92_v30  }
  0x98   :  { %v99_v31 = vld [vmem:[#allocation0] sm:$0x1] }
  0x99   :  { %102 = vst [vmem:[%s210_s1] sm:$0x1] %v99_v31 }

// kernel: unet_down_forward.1
= control target key start
LH: loop header
LB: loop body
LE: loop exit
PB: predicated region body
PF: predicated region fallthrough
CT: control target
= control target key end

     0   :  { %vm82_vm0 = vcmask 523264   ;;  %v4934_v36 = vmov 0.0   ;;  %vm3637_vm1 = vmmov 0   ;;  %vm839_vm6 = vcmask 130048   ;;  %s4923_s1 = inlined_call_operand.vmem [shape: f32[3,64,128], index: 1, kind: input, shape index: {}]   ;;  %s4924_s0 = inlined_call_operand.vmem [shape: f32[2,18,64], index: 0, kind: input, shape index: {}]   ;;  %s4925_s4 = inlined_call_operand.vmem [shape: f32[128,128], index: 4, kind: input, shape index: {}]   ;;  %s4926_s3 = inlined_call_operand.vmem [shape: f32[4,128], index: 3, kind: input, shape index: {}]   ;;  %s4927_s5 = inlined_call_operand.vmem [shape: f32[18,16], index: 5, kind: input, shape index: {}]   ;;  %s4928_s2 = inlined_call_operand.vmem [shape: f32[3,128,128], index: 2, kind: input, shape index: {}]   ;;  %s4929_s6 = inlined_call_operand.vmem [shape: f32[8,16], index: 6, kind: input, shape index: {}]   ;;  %s4930_s7 = inlined_call_operand.vmem [shape: f32[8,16], index: 7, kind: input, shape index: {}]   ;;  %s4931_s8 = inlined_call_operand.vmem [shape: f32[128,64], index: 8, kind: input, shape index: {}]   ;;  %s4932_s9 = inlined_call_operand.vmem [shape: f32[128,64], index: 9, kind: input, shape index: {}]   ;;  %s4933_s10 = inlined_call_operand.vmem [shape: f32[2,8,64], index: 10, kind: output, shape index: {}]  }
   0x1   :  { %v2526_v0 = vld [vmem:[%s4923_s1 + $0x78] sm:$0xff]  ;;  %v3705_v2 = vld [vmem:[%s4923_s1 + $0x70] sm:$0xff]  ;;  %v3717_v4 = vld [vmem:[%s4923_s1 + $0x68] sm:$0xff] }
   0x2   :  { %v3700_v1 = vld [vmem:[%s4923_s1 + $0x38] sm:$0xff]  ;;  %2922 = vmatprep.subr.mxu0 %v2526_v0  ;;  %v3711_v3 = vld [vmem:[%s4923_s1 + $0x30] sm:$0xff]  ;;  %v3722_v5 = vld [vmem:[%s4923_s1 + $0x28] sm:$0xff] }
   0x3   :  { %2941 = vmatprep.subr.mxu1 %v3700_v1  ;;  %2923 = vmatpush3.msra.mxu0 %v2526_v0  ;;  %v3731_v6 = vld [vmem:[%s4923_s1 + $0x60] sm:$0xff]  ;;  %v2522_v8 = vld [vmem:[%s4923_s1 + $0x58] sm:$0xff]  ;;  %v2521_v10 = vld [vmem:[%s4923_s1 + $0x50] sm:$0xff] }
   0x4   :  { %2942 = vmatpush3.msra.mxu1 %v3700_v1  ;;  %2924 = vmatprep.subr.mxu0 %v3705_v2  ;;  %v3736_v7 = vld [vmem:[%s4923_s1 + $0x20] sm:$0xff]  ;;  %v3748_v9 = vld [vmem:[%s4923_s1 + $0x18] sm:$0xff]  ;;  %v3760_v11 = vld [vmem:[%s4923_s1 + $0x10] sm:$0xff] }
   0x5   :  { %2943 = vmatprep.subr.mxu1 %v3711_v3  ;;  %2925 = vmatpush3.msra.mxu0 %v3705_v2  ;;  %v2520_v12 = vld [vmem:[%s4923_s1 + $0x48] sm:$0xff]  ;;  %v2519_v14 = vld [vmem:[%s4923_s1 + $0x40] sm:$0xff]  ;;  %v2534_v20 = vld [vmem:[%s4923_s1 + $0xb8] sm:$0xff] }
   0x6   :  { %2944 = vmatpush3.msra.mxu1 %v3711_v3  ;;  %2926 = vmatprep.subr.mxu0 %v3717_v4  ;;  %v3770_v13 = vld [vmem:[%s4923_s1 + $0x8] sm:$0xff]  ;;  %v3780_v15 = vld [vmem:[%s4923_s1] sm:$0xff]  ;;  %v2533_v21 = vld [vmem:[%s4923_s1 + $0xb0] sm:$0xff] }
   0x7   :  { %2945 = vmatprep.subr.mxu1 %v3722_v5  ;;  %2927 = vmatpush3.msra.mxu0 %v3717_v4  ;;  %v80_v16 = vld [vmem:[%s4924_s0 + $0x1] sm:$0xff]  ;;  %v81_v18 = vld [vmem:[%s4924_s0 + $0x9] sm:$0xff]  ;;  %v2530_v24 = vld [vmem:[%s4923_s1 + $0x98] sm:$0xff] }
   0x8   :  { %2946 = vmatpush3.msra.mxu1 %v3722_v5  ;;  %2928 = vmatprep.subr.mxu0 %v3731_v6  ;;  %v78_v17 = vld [vmem:[%s4924_s0] sm:$0xff]  ;;  %v79_v19 = vld [vmem:[%s4924_s0 + $0x8] sm:$0xff]  ;;  %v2529_v25 = vld [vmem:[%s4923_s1 + $0x90] sm:$0xff] }
   0x9   :  { %2947 = vmatprep.subr.mxu1 %v3736_v7  ;;  %2929 = vmatpush3.msra.mxu0 %v3731_v6  ;;  %v2532_v22 = vld [vmem:[%s4923_s1 + $0xa8] sm:$0xff]  ;;  %v2531_v23 = vld [vmem:[%s4923_s1 + $0xa0] sm:$0xff]  ;;  %v2541_v32 = vld [vmem:[%s4924_s0 + $0x18] sm:$0xff] }
   0xa   :  { %2948 = vmatpush3.msra.mxu1 %v3736_v7  ;;  %2930 = vmatprep.subr.mxu0 %v2522_v8  ;;  %v2528_v26 = vld [vmem:[%s4923_s1 + $0x88] sm:$0xff]  ;;  %v2527_v27 = vld [vmem:[%s4923_s1 + $0x80] sm:$0xff]  ;;  %v50_v37 = vld [vmem:[%s4925_s4 + $0x78] sm:$0xff] }
   0xb   :  { %2949 = vmatprep.subr.mxu1 %v3748_v9  ;;  %2931 = vmatpush3.msra.mxu0 %v2522_v8  ;;  %v245_v28 = vld [vmem:[%s4924_s0 + $0x2] sm:$0xff]  ;;  %v246_v29 = vld [vmem:[%s4924_s0 + $0xa] sm:$0xff]  ;;  %v2543_v30 = vld [vmem:[%s4924_s0 + $0x19] sm:$0xff] }
   0xc   :  { %2950 = vmatpush3.msra.mxu1 %v3748_v9  ;;  %2932 = vmatprep.subr.mxu0 %v2521_v10  ;;  %v2544_v31 = vld [vmem:[%s4924_s0 + $0x21] sm:$0xff]  ;;  %v49_v38 = vld [vmem:[%s4925_s4 + $0x70] sm:$0xff]  ;;  %v46_v41 = vld [vmem:[%s4925_s4 + $0x58] sm:$0xff] }
   0xd   :  { %2951 = vmatprep.subr.mxu1 %v3760_v11  ;;  %2933 = vmatpush3.msra.mxu0 %v2521_v10  ;;  %v2549_v33 = vld [vmem:[%s4924_s0 + $0x1a] sm:$0xff]  ;;  %v2550_v35 = vld [vmem:[%s4924_s0 + $0x22] sm:$0xff]  ;;  %v45_v42 = vld [vmem:[%s4925_s4 + $0x50] sm:$0xff] }
   0xe   :  { %2952 = vmatpush3.msra.mxu1 %v3760_v11  ;;  %2934 = vmatprep.subr.mxu0 %v2520_v12  ;;  %v2542_v34 = vld [vmem:[%s4924_s0 + $0x20] sm:$0xff]  ;;  %v48_v39 = vld [vmem:[%s4925_s4 + $0x68] sm:$0xff]  ;;  %v42_v45 = vld [vmem:[%s4925_s4 + $0x38] sm:$0xff] }
   0xf   :  { %2953 = vmatprep.subr.mxu1 %v3770_v13  ;;  %2935 = vmatpush3.msra.mxu0 %v2520_v12  ;;  %v47_v40 = vld [vmem:[%s4925_s4 + $0x60] sm:$0xff]  ;;  %v44_v43 = vld [vmem:[%s4925_s4 + $0x48] sm:$0xff]  ;;  %v41_v46 = vld [vmem:[%s4925_s4 + $0x30] sm:$0xff] }
  0x10   :  { %2954 = vmatpush3.msra.mxu1 %v3770_v13  ;;  %2936 = vmatprep.subr.mxu0 %v2519_v14  ;;  %v43_v44 = vld [vmem:[%s4925_s4 + $0x40] sm:$0xff]  ;;  %v40_v47 = vld [vmem:[%s4925_s4 + $0x28] sm:$0xff]  ;;  %v38_v49 = vld [vmem:[%s4925_s4 + $0x18] sm:$0xff] }
  0x11   :  { %2955 = vmatprep.subr.mxu1 %v3780_v15  ;;  %2937 = vmatpush3.msra.mxu0 %v2519_v14  ;;  %v39_v48 = vld [vmem:[%s4925_s4 + $0x20] sm:$0xff]  ;;  %v37_v50 = vld [vmem:[%s4925_s4 + $0x10] sm:$0xff]  ;;  %v36_v51 = vld [vmem:[%s4925_s4 + $0x8] sm:$0xff] }
  0x12   :  { %2938 = vmatprep.mubr.msk.f32.mxu0 %vm82_vm0, %v80_v16  ;;  %2956 = vmatpush3.msra.mxu1 %v3780_v15  ;;  %v35_v52 = vld [vmem:[%s4925_s4] sm:$0xff] }
  0x13   :  { %2957 = vmatprep.mubr.msk.f32.mxu1 %vm82_vm0, %v78_v17  ;;  %2939 = vmatmul.mubr.msk.f32.vlgmr.msra.gmra.mxu0 %vm82_vm0, %v81_v18 }
  0x14   :  { %2958 = vmatmul.mubr.msk.f32.vlgmr.msra.gmra.mxu1 %vm82_vm0, %v79_v19  ;;  %2960 = vmatprep.subr.mxu0 %v2534_v20 }
  0x15   :  { %2979 = vmatprep.subr.mxu1 %v2526_v0  ;;  %2961 = vmatpush3.msra.mxu0 %v2534_v20 }
  0x16   :  { %2980 = vmatpush3.msra.mxu1 %v2526_v0  ;;  %2962 = vmatprep.subr.mxu0 %v2533_v21 }
  0x17   :  { %2981 = vmatprep.subr.mxu1 %v3705_v2  ;;  %2963 = vmatpush3.msra.mxu0 %v2533_v21 }
  0x18   :  { %2982 = vmatpush3.msra.mxu1 %v3705_v2  ;;  %2964 = vmatprep.subr.mxu0 %v2532_v22 }
  0x19   :  { %2983 = vmatprep.subr.mxu1 %v3717_v4  ;;  %2965 = vmatpush3.msra.mxu0 %v2532_v22 }
  0x1a   :  { %2984 = vmatpush3.msra.mxu1 %v3717_v4  ;;  %2966 = vmatprep.subr.mxu0 %v2531_v23 }
  0x1b   :  { %2985 = vmatprep.subr.mxu1 %v3731_v6  ;;  %2967 = vmatpush3.msra.mxu0 %v2531_v23 }
  0x1c   :  { %2986 = vmatpush3.msra.mxu1 %v3731_v6  ;;  %2968 = vmatprep.subr.mxu0 %v2530_v24 }
  0x1d   :  { %2987 = vmatprep.subr.mxu1 %v2522_v8  ;;  %2969 = vmatpush3.msra.mxu0 %v2530_v24 }
  0x1e   :  { %2988 = vmatpush3.msra.mxu1 %v2522_v8  ;;  %2970 = vmatprep.subr.mxu0 %v2529_v25 }
  0x1f   :  { %2989 = vmatprep.subr.mxu1 %v2521_v10  ;;  %2971 = vmatpush3.msra.mxu0 %v2529_v25 }
  0x20   :  { %2990 = vmatpush3.msra.mxu1 %v2521_v10  ;;  %2972 = vmatprep.subr.mxu0 %v2528_v26 }
  0x21   :  { %2991 = vmatprep.subr.mxu1 %v2520_v12  ;;  %2973 = vmatpush3.msra.mxu0 %v2528_v26 }
  0x22   :  { %2992 = vmatpush3.msra.mxu1 %v2520_v12  ;;  %2974 = vmatprep.subr.mxu0 %v2527_v27 }
  0x23   :  { %2993 = vmatprep.subr.mxu1 %v2519_v14  ;;  %2975 = vmatpush3.msra.mxu0 %v2527_v27 }
  0x24   :  { %2976 = vmatprep.mubr.msk.f32.mxu0 %vm82_vm0, %v245_v28  ;;  %2994 = vmatpush3.msra.mxu1 %v2519_v14 }
  0x25   :  { %2977 = vmatmul.mubr.msk.f32.vlgmr.msra.gmra.mxu0 %vm82_vm0, %v246_v29  ;;  %2995 = vmatprep.mubr.msk.f32.mxu1 %vm82_vm0, %v2543_v30 }
  0x26   :  { %2998 = vmatprep.subr.mxu0 %v3700_v1  ;;  %3017 = vmatprep.subr.mxu1 %v2534_v20 }
  0x27   :  { %2996 = vmatmul.mubr.msk.f32.vlgmr.msra.gmra.mxu1 %vm82_vm0, %v2544_v31  ;;  %2999 = vmatpush3.msra.mxu0 %v3700_v1 }
  0x28   :  { %3018 = vmatpush3.msra.mxu1 %v2534_v20  ;;  %3000 = vmatprep.subr.mxu0 %v3711_v3 }
  0x29   :  { %3019 = vmatprep.subr.mxu1 %v2533_v21  ;;  %3001 = vmatpush3.msra.mxu0 %v3711_v3 }
  0x2a   :  { %3020 = vmatpush3.msra.mxu1 %v2533_v21  ;;  %3002 = vmatprep.subr.mxu0 %v3722_v5 }
  0x2b   :  { %3021 = vmatprep.subr.mxu1 %v2532_v22  ;;  %3003 = vmatpush3.msra.mxu0 %v3722_v5 }
  0x2c   :  { %3022 = vmatpush3.msra.mxu1 %v2532_v22  ;;  %3004 = vmatprep.subr.mxu0 %v3736_v7 }
  0x2d   :  { %3023 = vmatprep.subr.mxu1 %v2531_v23  ;;  %3005 = vmatpush3.msra.mxu0 %v3736_v7 }
  0x2e   :  { %3024 = vmatpush3.msra.mxu1 %v2531_v23  ;;  %3006 = vmatprep.subr.mxu0 %v3748_v9 }
  0x2f   :  { %3025 = vmatprep.subr.mxu1 %v2530_v24  ;;  %3007 = vmatpush3.msra.mxu0 %v3748_v9 }
  0x30   :  { %3026 = vmatpush3.msra.mxu1 %v2530_v24  ;;  %3008 = vmatprep.subr.mxu0 %v3760_v11 }
  0x31   :  { %3027 = vmatprep.subr.mxu1 %v2529_v25  ;;  %3009 = vmatpush3.msra.mxu0 %v3760_v11 }
  0x32   :  { %3028 = vmatpush3.msra.mxu1 %v2529_v25  ;;  %3010 = vmatprep.subr.mxu0 %v3770_v13 }
  0x33   :  { %3029 = vmatprep.subr.mxu1 %v2528_v26  ;;  %3011 = vmatpush3.msra.mxu0 %v3770_v13 }
  0x34   :  { %3030 = vmatpush3.msra.mxu1 %v2528_v26  ;;  %3012 = vmatprep.subr.mxu0 %v3780_v15 }
  0x35   :  { %3031 = vmatprep.subr.mxu1 %v2527_v27  ;;  %3013 = vmatpush3.msra.mxu0 %v3780_v15 }
  0x36   :  { %3014 = vmatprep.mubr.msk.f32.mxu0 %vm82_vm0, %v2541_v32  ;;  %3032 = vmatpush3.msra.mxu1 %v2527_v27 }
  0x37   :  { %3033 = vmatprep.mubr.msk.f32.mxu1 %vm82_vm0, %v2549_v33  ;;  %3015 = vmatmul.mubr.msk.f32.vlgmr.msra.gmra.mxu0 %vm82_vm0, %v2542_v34 }
  0x38   :  { %3034 = vmatmul.mubr.msk.f32.vlgmr.msra.gmra.mxu1 %vm82_vm0, %v2550_v35  ;;  %3036 = vmatprep.subr.mxu0 %v4934_v36 }
  0x39   :  { %3071 = vmatprep.subr.mxu1 %v4934_v36  ;;  %3037 = vmatpush3.msra.mxu0 %v50_v37 }
  0x3a   :  { %3072 = vmatpush3.msra.mxu1 %v50_v37  ;;  %3038 = vmatprep.subr.mxu0 %v4934_v36 }
  0x3b   :  { %3073 = vmatprep.subr.mxu1 %v4934_v36  ;;  %3039 = vmatpush3.msra.mxu0 %v49_v38 }
  0x3c   :  { %3074 = vmatpush3.msra.mxu1 %v49_v38  ;;  %3040 = vmatprep.subr.mxu0 %v4934_v36 }
  0x3d   :  { %3075 = vmatprep.subr.mxu1 %v4934_v36  ;;  %3041 = vmatpush3.msra.mxu0 %v48_v39 }
  0x3e   :  { %3076 = vmatpush3.msra.mxu1 %v48_v39  ;;  %3042 = vmatprep.subr.mxu0 %v4934_v36 }
  0x3f   :  { %3077 = vmatprep.subr.mxu1 %v4934_v36  ;;  %3043 = vmatpush3.msra.mxu0 %v47_v40 }
  0x40   :  { %3078 = vmatpush3.msra.mxu1 %v47_v40  ;;  %3044 = vmatprep.subr.mxu0 %v4934_v36 }
  0x41   :  { %3079 = vmatprep.subr.mxu1 %v4934_v36  ;;  %3045 = vmatpush3.msra.mxu0 %v46_v41 }
  0x42   :  { %3080 = vmatpush3.msra.mxu1 %v46_v41  ;;  %3046 = vmatprep.subr.mxu0 %v4934_v36 }
  0x43   :  { %3081 = vmatprep.subr.mxu1 %v4934_v36  ;;  %3047 = vmatpush3.msra.mxu0 %v45_v42 }
  0x44   :  { %3082 = vmatpush3.msra.mxu1 %v45_v42  ;;  %3048 = vmatprep.subr.mxu0 %v4934_v36 }
  0x45   :  { %3083 = vmatprep.subr.mxu1 %v4934_v36  ;;  %3049 = vmatpush3.msra.mxu0 %v44_v43 }
  0x46   :  { %3084 = vmatpush3.msra.mxu1 %v44_v43  ;;  %3050 = vmatprep.subr.mxu0 %v4934_v36 }
  0x47   :  { %3085 = vmatprep.subr.mxu1 %v4934_v36  ;;  %3051 = vmatpush3.msra.mxu0 %v43_v44 }
  0x48   :  { %3086 = vmatpush3.msra.mxu1 %v43_v44  ;;  %3052 = vmatprep.subr.mxu0 %v4934_v36 }
  0x49   :  { %3087 = vmatprep.subr.mxu1 %v4934_v36  ;;  %3053 = vmatpush3.msra.mxu0 %v42_v45 }
  0x4a   :  { %3088 = vmatpush3.msra.mxu1 %v42_v45  ;;  %3054 = vmatprep.subr.mxu0 %v4934_v36 }
  0x4b   :  { %3089 = vmatprep.subr.mxu1 %v4934_v36  ;;  %3055 = vmatpush3.msra.mxu0 %v41_v46 }
  0x4c   :  { %3090 = vmatpush3.msra.mxu1 %v41_v46  ;;  %3056 = vmatprep.subr.mxu0 %v4934_v36 }
  0x4d   :  { %3091 = vmatprep.subr.mxu1 %v4934_v36  ;;  %3057 = vmatpush3.msra.mxu0 %v40_v47 }
  0x4e   :  { %3092 = vmatpush3.msra.mxu1 %v40_v47  ;;  %3058 = vmatprep.subr.mxu0 %v4934_v36 }
  0x4f   :  { %3093 = vmatprep.subr.mxu1 %v4934_v36  ;;  %3059 = vmatpush3.msra.mxu0 %v39_v48 }
  0x50   :  { %3094 = vmatpush3.msra.mxu1 %v39_v48  ;;  %3060 = vmatprep.subr.mxu0 %v4934_v36 }
  0x51   :  { %3095 = vmatprep.subr.mxu1 %v4934_v36  ;;  %3061 = vmatpush3.msra.mxu0 %v38_v49 }
  0x52   :  { %3096 = vmatpush3.msra.mxu1 %v38_v49  ;;  %3062 = vmatprep.subr.mxu0 %v4934_v36 }
  0x53   :  { %3097 = vmatprep.subr.mxu1 %v4934_v36  ;;  %3063 = vmatpush3.msra.mxu0 %v37_v50 }
  0x54   :  { %3098 = vmatpush3.msra.mxu1 %v37_v50  ;;  %3064 = vmatprep.subr.mxu0 %v4934_v36 }
  0x55   :  { %3099 = vmatprep.subr.mxu1 %v4934_v36  ;;  %3065 = vmatpush3.msra.mxu0 %v36_v51 }
  0x56   :  { %3068 = vmatprep.mubr.msk.f32.mxu0 %vm3637_vm1, %v4934_v36  ;;  %3066 = vmatprep.subr.mxu0 %v4934_v36 }
  0x57   :  { %3100 = vmatpush3.msra.mxu1 %v36_v51  ;;  %3067 = vmatpush3.msra.mxu0 %v35_v52 }
  0x58   :  { %3101 = vmatprep.subr.mxu1 %v4934_v36  ;;  %3103 = vmatprep.mubr.msk.f32.mxu1 %vm3637_vm1, %v4934_v36 }
  0x59   :  { %3102 = vmatpush3.msra.mxu1 %v35_v52  ;;  %3106 = vmatprep.subr.mxu0 %v4934_v36 }
  0x5a   :  { %3119 = vmatprep.subr.mxu1 %v4934_v36 }
  0xd3   :  { %v2940_v53 = vpop.f32.mrf.mxu0 }
  0xd4   :  { %v2959_v54 = vpop.f32.mrf.mxu1 }
  0xd5   :  { %v155_v55 = vpop.f32.mrf.mxu0  ;;  %v242_v60 = vadd.f32 %v2959_v54, %v2940_v53  ;;  %v773_v53 = vlaneseq }
  0xd6   :  { %v236_v57 = vpop.f32.mrf.mxu1 }
  0xd7   :  { %v237_v59 = vadd.f32 %v236_v57, %v155_v55  ;;  %v3980_v54 = vshrl.u32 %v773_v53, 7  ;;  %v51_v55 = vld [vmem:[%s4926_s3] sm:$0xf] }
  0xe5   :  { %v2978_v56 = vpop.f32.mrf.mxu0 }
  0xe6   :  { %v3968_v62 = vadd.f32 %v2978_v56, %v242_v60 }
  0xe7   :  { %v319_v58 = vpop.f32.mrf.mxu0  ;;  %v2997_v0 = vpop.f32.mrf.mxu1 }
  0xe8   :  { %v3966_v61 = vadd.f32 %v319_v58, %v237_v59  ;;  %v339_v1 = vmul.f32 %v3968_v62, %v3968_v62  ;;  %v775_v58 = vsub.s32 0, %v3980_v54 }
  0xe9   :  { %v425_v4 = vpop.f32.mrf.mxu1 }
  0xea   :  { %v338_v63 = vmul.f32 %v3966_v61, %v3966_v61  ;;  %v330_v2 = vadd.f32 %v3968_v62, %v3966_v61 }
  0xec   :  { %v340_v3 = vadd.f32 %v339_v1, %v338_v63  ;;  %v331_v5 = vrot.slane %v330_v2, 4 }
  0xee   :  { %v341_v8 = vrot.slane %v340_v3, 4  ;;  %v332_v11 = vadd.f32 %v331_v5, %v330_v2 }
  0xf0   :  { %v342_v15 = vadd.f32 %v341_v8, %v340_v3  ;;  %v333_v17 = vrot.slane %v332_v11, 2 }
  0xf2   :  { %v343_v21 = vrot.slane %v342_v15, 2  ;;  %v334_v24 = vadd.f32 %v333_v17, %v332_v11 }
  0xf4   :  { %v344_v27 = vadd.f32 %v343_v21, %v342_v15  ;;  %v335_v30 = vrot.slane %v334_v24, 1 }
  0xf6   :  { %v345_v35 = vrot.slane %v344_v27, 1  ;;  %v336_v37 = vadd.f32 %v335_v30, %v334_v24 }
  0xf7   :  { %v3016_v6 = vpop.f32.mrf.mxu0 }
  0xf8   :  { %v3035_v7 = vpop.f32.mrf.mxu1  ;;  %v512_v9 = vadd.f32 %v3016_v6, %v2997_v0  ;;  %v346_v41 = vadd.f32 %v345_v35, %v344_v27  ;;  %v781_v0 = vsub.s32 1, %v3980_v54 }
  0xf9   :  { %v506_v10 = vpop.f32.mrf.mxu0 }
  0xfa   :  { %v599_v12 = vadd.f32 %v3035_v7, %v512_v9  ;;  %v507_v13 = vadd.f32 %v506_v10, %v425_v4  ;;  %v589_v14 = vpop.f32.mrf.mxu1 }
  0xfc   :  { %v598_v16 = vadd.f32 %v589_v14, %v507_v13  ;;  %v609_v18 = vmul.f32 %v599_v12, %v599_v12 }
  0xfe   :  { %v600_v19 = vadd.f32 %v599_v12, %v598_v16  ;;  %v608_v20 = vmul.f32 %v598_v16, %v598_v16 }
 0x100   :  { %v601_v22 = vrot.slane %v600_v19, 4  ;;  %v610_v23 = vadd.f32 %v609_v18, %v608_v20 }
 0x102   :  { %v602_v25 = vadd.f32 %v601_v22, %v600_v19  ;;  %v611_v26 = vrot.slane %v610_v23, 4 }
 0x104   :  { %v603_v28 = vrot.slane %v602_v25, 2  ;;  %v612_v29 = vadd.f32 %v611_v26, %v610_v23 }
 0x106   :  { %v604_v31 = vadd.f32 %v603_v28, %v602_v25  ;;  %v613_v32 = vrot.slane %v612_v29, 2 }
 0x108   :  { %v605_v33 = vrot.slane %v604_v31, 1  ;;  %v614_v34 = vadd.f32 %v613_v32, %v612_v29 }
 0x10a   :  { %v606_v38 = vadd.f32 %v605_v33, %v604_v31  ;;  %v615_v39 = vrot.slane %v614_v34, 1 }
 0x10c   :  { %v607_v40 = vadd.f32 %v606_v38, %v336_v37  ;;  %v616_v42 = vadd.f32 %v615_v39, %v614_v34 }
 0x10e   :  { %3069 = vmatmul.mubr.f32.vlgmr.msra.gmra.mxu0 %v607_v40  ;;  %v617_v43 = vadd.f32 %v616_v42, %v346_v41 }
 0x10f   :  { %3110 = vmatprep.mubr.msk.f32.mxu0 %vm3637_vm1, %v4934_v36 }
 0x110   :  { %3104 = vmatmul.mubr.f32.vlgmr.msra.gmra.mxu1 %v617_v43 }
 0x111   :  { %3123 = vmatprep.mubr.msk.f32.mxu1 %vm3637_vm1, %v4934_v36 }
 0x1ce   :  { %v684_v44 = vpop.f32.mrf.mxu0 }
 0x1cf   :  { %v688_v45 = vmul.f32 0.001953125, %v684_v44 }
 0x1d0   :  { %v3070_v46 = vpop.f32.mrf.mxu0  ;;  %v755_v47 = vpop.f32.mrf.mxu1 }
 0x1d1   :  { %v760_v48 = vmul.f32 %v688_v45, %v688_v45  ;;  %v759_v49 = vmul.f32 0.001953125, %v755_v47 }
 0x1d2   :  { %v3105_v50 = vpop.f32.mrf.mxu1 }
 0x1d3   :  { %v761_v51 = vsub.f32 %v759_v49, %v760_v48 }
 0x1d5   :  { %v762_v52 = vadd.f32 1e-05, %v761_v51 }
 0x1d7   :  { %3583 = vrsqrt.f32 %v762_v52 }
 0x1e4   :  { %v3584_v56 = vpop.eup %3583 }
 0x1e5   :  { %v764_v57 = vmul.f32 %v3584_v56, %v51_v55 }
 0x1e7   :  { %v765_v59 = vmul.f32 %v764_v57, %v688_v45  ;;  %v776_v63 = vrot.slane %v764_v57, %v775_v58 }
 0x1e9   :  { %v767_v60 = vrot.slane %v765_v59, 7  ;;  %v778_v2 = vmul.f32 %v776_v63, %v3968_v62  ;;  %v933_v4 = vmul.f32 %v776_v63, %v599_v12  ;;  %v777_v5 = vmul.f32 %v776_v63, %v3966_v61 }
 0x1ea   :  { %v932_v6 = vmul.f32 %v776_v63, %v598_v16 }
 0x1eb   :  { %v769_v1 = vsub.f32 %v51_v55, %v767_v60 }
 0x1ed   :  { %v782_v3 = vrot.slane %v769_v1, %v781_v0 }
 0x1ef   :  { %v3989_v7 = vadd.f32 %v782_v3, %v778_v2  ;;  %v3991_v8 = vadd.f32 %v933_v4, %v782_v3  ;;  %v3993_v9 = vadd.f32 %v782_v3, %v777_v5  ;;  %v3995_v10 = vadd.f32 %v932_v6, %v782_v3 }
 0x1f1   :  { %v3998_v11 = vmul.f32 0.70710677, %v3989_v7  ;;  %v4001_v13 = vmul.f32 0.70710677, %v3991_v8  ;;  %v4004_v62 = vmul.f32 0.70710677, %v3993_v9 }
 0x1f2   :  { %v4010_v15 = vmul.f32 0.70710677, %v3995_v10 }
 0x1f3   :  { %v794_v61 = vand.u32 2147483647, %v3998_v11  ;;  %v945_v12 = vand.u32 2147483647, %v4001_v13  ;;  %v793_v14 = vand.u32 2147483647, %v4004_v62 }
 0x1f4   :  { %v944_v21 = vand.u32 2147483647, %v4010_v15  ;;  %vm790_vm2 = vcmp.ge.f32.partialorder %v3998_v11, 0.0  ;;  %vm941_vm3 = vcmp.ge.f32.partialorder %v4001_v13, 0.0  ;;  %vm789_vm4 = vcmp.ge.f32.partialorder %v4004_v62, 0.0 }
 0x1f5   :  { %v796_v16 = vmul.f32 0.3275911, %v794_v61  ;;  %v947_v17 = vmul.f32 0.3275911, %v945_v12  ;;  %v795_v18 = vmul.f32 0.3275911, %v793_v14 }
 0x1f6   :  { %v946_v23 = vmul.f32 0.3275911, %v944_v21  ;;  %v822_v25 = vsub.f32 0.0, %v794_v61  ;;  %v973_v26 = vsub.f32 0.0, %v945_v12  ;;  %v821_v28 = vsub.f32 0.0, %v793_v14 }
 0x1f7   :  { %v798_v19 = vadd.f32 1.0, %v796_v16  ;;  %v949_v20 = vadd.f32 1.0, %v947_v17  ;;  %v797_v22 = vadd.f32 1.0, %v795_v18  ;;  %v972_v30 = vsub.f32 0.0, %v944_v21 }
 0x1f8   :  { %v948_v24 = vadd.f32 1.0, %v946_v23  ;;  %v824_v27 = vmul.f32 %v822_v25, %v794_v61  ;;  %v975_v29 = vmul.f32 %v973_v26, %v945_v12  ;;  %v823_v35 = vmul.f32 %v821_v28, %v793_v14 }
 0x1f9   :  { %3585 = vrcp.f32 %v798_v19  ;;  %v974_v39 = vmul.f32 %v972_v30, %v944_v21  ;;  %v4936_v28 = vmov -1.0   ;;  %v786_v13 = vmul.f32 0.5, %v3989_v7 }
 0x1fa   :  { %3587 = vrcp.f32 %v949_v20  ;;  %v827_v34 = vmul.f32 1.442695, %v824_v27  ;;  %v978_v38 = vmul.f32 1.442695, %v975_v29  ;;  %v825_v45 = vmul.f32 1.442695, %v823_v35 }
 0x1fb   :  { %3589 = vrcp.f32 %v797_v22  ;;  %v976_v48 = vmul.f32 1.442695, %v974_v39  ;;  %v792_v29 = vsel %vm790_vm2, 1.0, %v4936_v28  ;;  %v943_v30 = vsel %vm941_vm3, 1.0, %v4936_v28 }
 0x1fc   :  { %3591 = vrcp.f32 %v948_v24  ;;  %vm940_vm5 = vcmp.ge.f32.partialorder %v4010_v15, 0.0  ;;  %v785_v7 = vmul.f32 0.5, %v3993_v9  ;;  %v936_v15 = vmul.f32 0.5, %v3995_v10  ;;  %v4033_v9 = vld [vmem:[%s4928_s2 + $0xf8] sm:$0xff]  ;;  %v771_v10 = vld [vmem:[%s4927_s5 + $0x8] sm:$0xff] }
 0x1fd   :  { %3593 = vpow2.f32 %v827_v34 }
 0x1fe   :  { %3595 = vpow2.f32 %v978_v38 }
 0x1ff   :  { %3597 = vpow2.f32 %v825_v45 }
 0x200   :  { %3599 = vpow2.f32 %v976_v48 }
 0x206   :  { %v3586_v31 = vpop.eup %3585 }
 0x207   :  { %v3588_v32 = vpop.eup %3587  ;;  %v804_v33 = vmul.f32 1.0614054, %v3586_v31 }
 0x208   :  { %v955_v37 = vmul.f32 1.0614054, %v3588_v32  ;;  %v3590_v41 = vpop.eup %3589 }
 0x209   :  { %v806_v40 = vadd.f32 -1.4531521, %v804_v33  ;;  %v803_v44 = vmul.f32 1.0614054, %v3590_v41  ;;  %v3592_v46 = vpop.eup %3591 }
 0x20a   :  { %v957_v42 = vadd.f32 -1.4531521, %v955_v37  ;;  %v954_v51 = vmul.f32 1.0614054, %v3592_v46  ;;  %v3594_v17 = vpop.eup %3593 }
 0x20b   :  { %v808_v43 = vmul.f32 %v3586_v31, %v806_v40  ;;  %v805_v50 = vadd.f32 -1.4531521, %v803_v44  ;;  %v3596_v19 = vpop.eup %3595  ;;  %v937_v40 = vmul.f32 0.5, %v3991_v8 }
 0x20c   :  { %v959_v47 = vmul.f32 %v3588_v32, %v957_v42  ;;  %v956_v56 = vadd.f32 -1.4531521, %v954_v51  ;;  %v3598_v27 = vpop.eup %3597  ;;  %v791_v42 = vsel %vm789_vm4, 1.0, %v4936_v28 }
 0x20d   :  { %v810_v49 = vadd.f32 1.4214138, %v808_v43  ;;  %v807_v55 = vmul.f32 %v3590_v41, %v805_v50  ;;  %v3600_v34 = vpop.eup %3599  ;;  %v770_v50 = vld [vmem:[%s4927_s5] sm:$0xff] }
 0x20e   :  { %v961_v52 = vadd.f32 1.4214138, %v959_v47  ;;  %v958_v60 = vmul.f32 %v3592_v46, %v956_v56  ;;  %v772_v56 = vld [vmem:[%s4927_s5 + $0x10] sm:$0x3] }
 0x20f   :  { %v812_v53 = vmul.f32 %v3586_v31, %v810_v49  ;;  %v809_v59 = vadd.f32 1.4214138, %v807_v55  ;;  %v4060_v55 = vld [vmem:[%s4928_s2 + $0x68] sm:$0xff] }
 0x210   :  { %v963_v57 = vmul.f32 %v3588_v32, %v961_v52  ;;  %v960_v2 = vadd.f32 1.4214138, %v958_v60  ;;  %v4038_v52 = vld [vmem:[%s4928_s2 + $0x78] sm:$0xff] }
 0x211   :  { %v814_v58 = vadd.f32 -0.28449672, %v812_v53  ;;  %v811_v1 = vmul.f32 %v3590_v41, %v809_v59  ;;  %v4050_v53 = vld [vmem:[%s4928_s2 + $0x70] sm:$0xff]  ;;  %v4090_v59 = vld [vmem:[%s4928_s2 + $0xe8] sm:$0xff]  ;;  %v4097_v60 = vld [vmem:[%s4928_s2 + $0x58] sm:$0xff] }
 0x212   :  { %v965_v63 = vadd.f32 -0.28449672, %v963_v57  ;;  %v962_v6 = vmul.f32 %v3592_v46, %v960_v2  ;;  %v4075_v57 = vld [vmem:[%s4928_s2 + $0xf0] sm:$0xff]  ;;  %v4125_v2 = vld [vmem:[%s4928_s2 + $0x48] sm:$0xff] }
 0x213   :  { %v816_v0 = vmul.f32 %v3586_v31, %v814_v58  ;;  %v813_v5 = vadd.f32 -0.28449672, %v811_v1  ;;  %v4080_v58 = vld [vmem:[%s4928_s2 + $0x60] sm:$0xff]  ;;  %v4118_v1 = vld [vmem:[%s4928_s2 + $0xd8] sm:$0xff] }
 0x214   :  { %v967_v3 = vmul.f32 %v3588_v32, %v965_v63  ;;  %v964_v16 = vadd.f32 -0.28449672, %v962_v6  ;;  %v4104_v63 = vld [vmem:[%s4928_s2 + $0xe0] sm:$0xff]  ;;  %v4153_v6 = vld [vmem:[%s4928_s2 + $0x38] sm:$0xff] }
 0x215   :  { %v818_v4 = vadd.f32 0.2548296, %v816_v0  ;;  %v815_v14 = vmul.f32 %v3590_v41, %v813_v5  ;;  %v4111_v0 = vld [vmem:[%s4928_s2 + $0x50] sm:$0xff]  ;;  %v4146_v5 = vld [vmem:[%s4928_s2 + $0xc8] sm:$0xff] }
 0x216   :  { %v969_v61 = vadd.f32 0.2548296, %v967_v3  ;;  %v966_v22 = vmul.f32 %v3592_v46, %v964_v16  ;;  %v4132_v3 = vld [vmem:[%s4928_s2 + $0xd0] sm:$0xff]  ;;  %v4186_v16 = vld [vmem:[%s4928_s2 + $0x20] sm:$0xff] }
 0x217   :  { %v820_v12 = vmul.f32 %v3586_v31, %v818_v4  ;;  %v817_v21 = vadd.f32 0.2548296, %v815_v14  ;;  %v4139_v4 = vld [vmem:[%s4928_s2 + $0x40] sm:$0xff]  ;;  %v4179_v14 = vld [vmem:[%s4928_s2 + $0x28] sm:$0xff] }
 0x218   :  { %v971_v18 = vmul.f32 %v3588_v32, %v969_v61  ;;  %v968_v26 = vadd.f32 0.2548296, %v966_v22  ;;  %v4160_v61 = vld [vmem:[%s4928_s2 + $0xc0] sm:$0xff]  ;;  %v4227_v22 = vld [vmem:[%s4928_s2 + $0xa8] sm:$0xff] }
 0x219   :  { %v830_v20 = vmul.f32 %v3594_v17, %v820_v12  ;;  %v819_v25 = vmul.f32 %v3590_v41, %v817_v21  ;;  %v4167_v12 = vld [vmem:[%s4928_s2 + $0x30] sm:$0xff]  ;;  %v4193_v17 = vld [vmem:[%s4928_s2 + $0x18] sm:$0xff]  ;;  %v4219_v21 = vld [vmem:[%s4928_s2 + $0x8] sm:$0xff] }
 0x21a   :  { %v981_v23 = vmul.f32 %v3596_v19, %v971_v18  ;;  %v970_v32 = vmul.f32 %v3592_v46, %v968_v26  ;;  %v942_v46 = vsel %vm940_vm5, 1.0, %v4936_v28  ;;  %v4199_v18 = vld [vmem:[%s4928_s2 + $0xb8] sm:$0xff]  ;;  %v4205_v19 = vld [vmem:[%s4928_s2 + $0x10] sm:$0xff] }
 0x21b   :  { %v832_v24 = vsub.f32 1.0, %v830_v20  ;;  %v829_v11 = vmul.f32 %v3598_v27, %v819_v25  ;;  %v4211_v20 = vld [vmem:[%s4928_s2 + $0xb0] sm:$0xff]  ;;  %v4250_v25 = vld [vmem:[%s4928_s2 + $0x98] sm:$0xff]  ;;  %v4262_v27 = vld [vmem:[%s4928_s2 + $0x88] sm:$0xff] }
 0x21c   :  { %v983_v31 = vsub.f32 1.0, %v981_v23  ;;  %v980_v39 = vmul.f32 %v3600_v34, %v970_v32  ;;  %v4233_v23 = vld [vmem:[%s4928_s2] sm:$0xff]  ;;  %v4256_v26 = vld [vmem:[%s4928_s2 + $0x90] sm:$0xff] }
 0x21d   :  { %v834_v33 = vmul.f32 %v832_v24, %v792_v29  ;;  %v831_v38 = vsub.f32 1.0, %v829_v11  ;;  %v4239_v24 = vld [vmem:[%s4928_s2 + $0xa0] sm:$0xff] }
 0x21e   :  { %v985_v35 = vmul.f32 %v983_v31, %v943_v30  ;;  %v982_v45 = vsub.f32 1.0, %v980_v39  ;;  %v4269_v29 = vld [vmem:[%s4928_s2 + $0x80] sm:$0xff]  ;;  %v4276_v30 = vld [vmem:[%s4928_s2 + $0x178] sm:$0xff] }
 0x21f   :  { %v836_v37 = vadd.f32 1.0, %v834_v33  ;;  %v833_v44 = vmul.f32 %v831_v38, %v791_v42 }
 0x220   :  { %v987_v41 = vadd.f32 1.0, %v985_v35  ;;  %v984_v48 = vmul.f32 %v982_v45, %v942_v46  ;;  %v4300_v45 = vld [vmem:[%s4928_s2 + $0x170] sm:$0xff]  ;;  %v4308_v46 = vld [vmem:[%s4928_s2 + $0x168] sm:$0xff] }
 0x221   :  { %v838_v43 = vmul.f32 %v836_v37, %v786_v13  ;;  %v835_v47 = vadd.f32 1.0, %v833_v44 }
 0x222   :  { %v989_v62 = vmul.f32 %v987_v41, %v937_v40  ;;  %v986_v49 = vadd.f32 1.0, %v984_v48  ;;  %v4334_v48 = vld [vmem:[%s4928_s2 + $0x150] sm:$0xff] }
 0x223   :  { %3107 = vmatpush3.msra.mxu0 %v838_v43  ;;  %v837_v8 = vmul.f32 %v835_v47, %v785_v7  ;;  %v4316_v7 = vld [vmem:[%s4928_s2 + $0x160] sm:$0xff]  ;;  %v4325_v47 = vld [vmem:[%s4928_s2 + $0x158] sm:$0xff] }
 0x224   :  { %3120 = vmatpush3.msra.mxu1 %v989_v62  ;;  %3108 = vmatprep.subr.mxu0 %v4934_v36  ;;  %v988_v51 = vmul.f32 %v986_v49, %v936_v15  ;;  %v4352_v15 = vld [vmem:[%s4928_s2 + $0x140] sm:$0xff]  ;;  %v4361_v49 = vld [vmem:[%s4928_s2 + $0x138] sm:$0xff] }
 0x225   :  { %3121 = vmatprep.subr.mxu1 %v4934_v36  ;;  %3109 = vmatpush3.msra.mxu0 %v837_v8  ;;  %v4343_v8 = vld [vmem:[%s4928_s2 + $0x148] sm:$0xff] }
 0x226   :  { %3111 = vmatmul.mubr.msk.f32.vlgmr.msra.gmra.mxu0 %vm839_vm6, %v770_v50  ;;  %3132 = vmatprep.subr.mxu0 %v4033_v9 }
 0x227   :  { %3122 = vmatpush3.msra.mxu1 %v988_v51  ;;  %3113 = vmatprep.mubr.msk.f32.mxu0 %vm3637_vm1, %v4934_v36 }
 0x228   :  { %3124 = vmatmul.mubr.msk.f32.vlgmr.msra.gmra.mxu1 %vm839_vm6, %v770_v50  ;;  %3167 = vmatprep.subr.mxu1 %v4038_v52  ;;  %v4370_v50 = vld [vmem:[%s4928_s2 + $0x130] sm:$0xff] }
 0x229   :  { %3126 = vmatprep.mubr.msk.f32.mxu1 %vm3637_vm1, %v4934_v36  ;;  %3168 = vmatpush3.msra.mxu1 %v4038_v52 }
 0x22a   :  { %3114 = vmatmul.mubr.msk.f32.gmra.mxu0 %vm839_vm6, %v771_v10  ;;  %3169 = vmatprep.subr.mxu1 %v4050_v53 }
 0x22b   :  { %3116 = vmatprep.mubr.msk.f32.mxu0 %vm3637_vm1, %v4934_v36  ;;  %3170 = vmatpush3.msra.mxu1 %v4050_v53 }
 0x22c   :  { %3127 = vmatmul.mubr.msk.f32.gmra.mxu1 %vm839_vm6, %v771_v10  ;;  %3171 = vmatprep.subr.mxu1 %v4060_v55  ;;  %v4388_v10 = vld [vmem:[%s4928_s2 + $0x120] sm:$0xff] }
 0x22d   :  { %3129 = vmatprep.mubr.msk.f32.mxu1 %vm3637_vm1, %v4934_v36  ;;  %3133 = vmatpush3.msra.mxu0 %v4033_v9 }
 0x22e   :  { %3117 = vmatmul.mubr.msk.f32.gmra.mxu0 %vm839_vm6, %v772_v56  ;;  %3172 = vmatpush3.msra.mxu1 %v4060_v55 }
 0x22f   :  { %3134 = vmatprep.subr.mxu0 %v4075_v57  ;;  %3173 = vmatprep.subr.mxu1 %v4080_v58 }
 0x230   :  { %3130 = vmatmul.mubr.msk.f32.gmra.mxu1 %vm839_vm6, %v772_v56  ;;  %3135 = vmatpush3.msra.mxu0 %v4075_v57  ;;  %v4397_v56 = vld [vmem:[%s4928_s2 + $0x118] sm:$0xff] }
 0x231   :  { %3174 = vmatpush3.msra.mxu1 %v4080_v58  ;;  %3136 = vmatprep.subr.mxu0 %v4090_v59 }
 0x232   :  { %3175 = vmatprep.subr.mxu1 %v4097_v60  ;;  %3137 = vmatpush3.msra.mxu0 %v4090_v59 }
 0x233   :  { %3176 = vmatpush3.msra.mxu1 %v4097_v60  ;;  %3138 = vmatprep.subr.mxu0 %v4104_v63 }
 0x234   :  { %3177 = vmatprep.subr.mxu1 %v4111_v0  ;;  %3139 = vmatpush3.msra.mxu0 %v4104_v63 }
 0x235   :  { %3178 = vmatpush3.msra.mxu1 %v4111_v0  ;;  %3140 = vmatprep.subr.mxu0 %v4118_v1 }
 0x236   :  { %3179 = vmatprep.subr.mxu1 %v4125_v2  ;;  %3141 = vmatpush3.msra.mxu0 %v4118_v1 }
 0x237   :  { %3180 = vmatpush3.msra.mxu1 %v4125_v2  ;;  %3142 = vmatprep.subr.mxu0 %v4132_v3 }
 0x238   :  { %3181 = vmatprep.subr.mxu1 %v4139_v4  ;;  %3143 = vmatpush3.msra.mxu0 %v4132_v3 }
 0x239   :  { %3182 = vmatpush3.msra.mxu1 %v4139_v4  ;;  %3144 = vmatprep.subr.mxu0 %v4146_v5 }
 0x23a   :  { %3183 = vmatprep.subr.mxu1 %v4153_v6  ;;  %3145 = vmatpush3.msra.mxu0 %v4146_v5 }
 0x23b   :  { %3184 = vmatpush3.msra.mxu1 %v4153_v6  ;;  %3146 = vmatprep.subr.mxu0 %v4160_v61 }
 0x23c   :  { %3185 = vmatprep.subr.mxu1 %v4167_v12  ;;  %3147 = vmatpush3.msra.mxu0 %v4160_v61 }
 0x23d   :  { %3186 = vmatpush3.msra.mxu1 %v4167_v12  ;;  %3148 = vmatprep.subr.mxu0 %v4199_v18 }
 0x23e   :  { %3187 = vmatprep.subr.mxu1 %v4179_v14  ;;  %3149 = vmatpush3.msra.mxu0 %v4199_v18 }
 0x23f   :  { %3188 = vmatpush3.msra.mxu1 %v4179_v14  ;;  %3150 = vmatprep.subr.mxu0 %v4211_v20 }
 0x240   :  { %3189 = vmatprep.subr.mxu1 %v4186_v16  ;;  %3151 = vmatpush3.msra.mxu0 %v4211_v20 }
 0x241   :  { %3190 = vmatpush3.msra.mxu1 %v4186_v16  ;;  %3152 = vmatprep.subr.mxu0 %v4227_v22 }
 0x242   :  { %3191 = vmatprep.subr.mxu1 %v4193_v17  ;;  %3153 = vmatpush3.msra.mxu0 %v4227_v22 }
 0x243   :  { %3192 = vmatpush3.msra.mxu1 %v4193_v17  ;;  %3154 = vmatprep.subr.mxu0 %v4239_v24 }
 0x244   :  { %3193 = vmatprep.subr.mxu1 %v4205_v19  ;;  %3155 = vmatpush3.msra.mxu0 %v4239_v24 }
 0x245   :  { %3194 = vmatpush3.msra.mxu1 %v4205_v19  ;;  %3156 = vmatprep.subr.mxu0 %v4250_v25 }
 0x246   :  { %3195 = vmatprep.subr.mxu1 %v4219_v21  ;;  %3157 = vmatpush3.msra.mxu0 %v4250_v25 }
 0x247   :  { %3196 = vmatpush3.msra.mxu1 %v4219_v21  ;;  %3158 = vmatprep.subr.mxu0 %v4256_v26 }
 0x248   :  { %3197 = vmatprep.subr.mxu1 %v4233_v23  ;;  %3159 = vmatpush3.msra.mxu0 %v4256_v26 }
 0x249   :  { %3198 = vmatpush3.msra.mxu1 %v4233_v23  ;;  %3160 = vmatprep.subr.mxu0 %v4262_v27 }
 0x24a   :  { %3237 = vmatprep.subr.mxu1 %v4033_v9  ;;  %3161 = vmatpush3.msra.mxu0 %v4262_v27 }
 0x24b   :  { %3162 = vmatprep.subr.mxu0 %v4269_v29 }
 0x24c   :  { %3163 = vmatpush3.msra.mxu0 %v4269_v29 }
 0x24d   :  { %3202 = vmatprep.subr.mxu0 %v4276_v30 }
 0x2e6   :  { %v915_v31 = vpop.f32.mrf.mxu0 }
 0x2e7   :  { %929 = vst [vmem:[#allocation2] sm:$0xff] %v915_v31  ;;  %3199 = vmatprep.mubr.f32.mxu1 %v915_v31 }
 0x2e8   :  { %v3112_v33 = vpop.f32.mrf.mxu0  ;;  %v4281_v11 = vpop.f32.mrf.mxu1 }
 0x2e9   :  { %1071 = vst [vmem:[#allocation2 + $0x18] sm:$0xff] %v4281_v11 }
 0x2ea   :  { %v920_v32 = vpop.f32.mrf.mxu0  ;;  %v3125_v34 = vpop.f32.mrf.mxu1 }
 0x2eb   :  { %930 = vst [vmem:[#allocation2 + $0x8] sm:$0xff] %v920_v32  ;;  %3200 = vmatmul.mubr.f32.vlgmr.msra.gmra.mxu1 %v920_v32 }
 0x2ec   :  { %v3115_v13 = vpop.f32.mrf.mxu0  ;;  %3238 = vmatpush3.msra.mxu1 %v4033_v9  ;;  %v4285_v35 = vpop.f32.mrf.mxu1  ;;  %v4379_v9 = vld [vmem:[%s4928_s2 + $0x128] sm:$0xff] }
 0x2ed   :  { %3239 = vmatprep.subr.mxu1 %v4075_v57  ;;  %1072 = vst [vmem:[#allocation2 + $0x20] sm:$0xff] %v4285_v35 }
 0x2ee   :  { %v925_v37 = vpop.f32.mrf.mxu0  ;;  %3240 = vmatpush3.msra.mxu1 %v4075_v57  ;;  %v3128_v38 = vpop.f32.mrf.mxu1 }
 0x2ef   :  { %931 = vst [vmem:[#allocation2 + $0x10] sm:$0x3] %v925_v37  ;;  %3241 = vmatprep.subr.mxu1 %v4090_v59 }
 0x2f0   :  { %v3118_v39 = vpop.f32.mrf.mxu0  ;;  %3242 = vmatpush3.msra.mxu1 %v4090_v59  ;;  %v1066_v40 = vpop.f32.mrf.mxu1  ;;  %v2577_v59 = vld [vmem:[%s4928_s2 + $0x110] sm:$0xff] }
 0x2f1   :  { %3243 = vmatprep.subr.mxu1 %v4104_v63  ;;  %1073 = vst [vmem:[#allocation2 + $0x28] sm:$0x3] %v1066_v40 }
 0x2f2   :  { %v1126_v41 = vld [vmem:[#allocation2 + $0x1] sm:$0xff]  ;;  %3244 = vmatpush3.msra.mxu1 %v4104_v63  ;;  %v3131_v42 = vpop.f32.mrf.mxu1 }
 0x2f3   :  { %3164 = vmatprep.mubr.f32.mxu0 %v1126_v41  ;;  %3245 = vmatprep.subr.mxu1 %v4118_v1  ;;  %v1278_v62 = vld [vmem:[#allocation2 + $0x2] sm:$0xff] }
 0x2f4   :  { %3246 = vmatpush3.msra.mxu1 %v4118_v1  ;;  %v1377_v43 = vld [vmem:[#allocation2 + $0x19] sm:$0xff]  ;;  %v2576_v63 = vld [vmem:[%s4928_s2 + $0x108] sm:$0xff] }
 0x2f5   :  { %3247 = vmatprep.subr.mxu1 %v4132_v3  ;;  %3269 = vmatprep.mubr.f32.mxu1 %v1377_v43  ;;  %v1529_v57 = vld [vmem:[#allocation2 + $0x1a] sm:$0xff] }
 0x2f6   :  { %v1127_v44 = vld [vmem:[#allocation2 + $0x9] sm:$0xff]  ;;  %3248 = vmatpush3.msra.mxu1 %v4132_v3  ;;  %v2575_v1 = vld [vmem:[%s4928_s2 + $0x100] sm:$0xff] }
 0x2f7   :  { %3165 = vmatmul.mubr.f32.vlgmr.msra.gmra.mxu0 %v1127_v44  ;;  %3249 = vmatprep.subr.mxu1 %v4146_v5  ;;  %v1279_v3 = vld [vmem:[#allocation2 + $0xa] sm:$0xff] }
 0x2f8   :  { %3203 = vmatpush3.msra.mxu0 %v4276_v30  ;;  %3234 = vmatprep.mubr.f32.mxu0 %v1278_v62  ;;  %v1378_v51 = vld [vmem:[#allocation2 + $0x21] sm:$0xff] }
 0x2f9   :  { %3204 = vmatprep.subr.mxu0 %v4300_v45  ;;  %3250 = vmatpush3.msra.mxu1 %v4146_v5  ;;  %v3626_v5 = vld [vmem:[%s4925_s4 + $0x40] sm:$0xff] }
 0x2fa   :  { %3205 = vmatpush3.msra.mxu0 %v4300_v45  ;;  %3251 = vmatprep.subr.mxu1 %v4160_v61 }
 0x2fb   :  { %3206 = vmatprep.subr.mxu0 %v4308_v46  ;;  %3252 = vmatpush3.msra.mxu1 %v4160_v61  ;;  %v3628_v61 = vld [vmem:[%s4925_s4 + $0x30] sm:$0xff] }
 0x2fc   :  { %3207 = vmatpush3.msra.mxu0 %v4308_v46  ;;  %3253 = vmatprep.subr.mxu1 %v4199_v18 }
 0x2fd   :  { %3208 = vmatprep.subr.mxu0 %v4316_v7  ;;  %3254 = vmatpush3.msra.mxu1 %v4199_v18  ;;  %v3633_v18 = vld [vmem:[%s4925_s4 + $0x8] sm:$0xff] }
 0x2fe   :  { %3209 = vmatpush3.msra.mxu0 %v4316_v7  ;;  %3255 = vmatprep.subr.mxu1 %v4211_v20 }
 0x2ff   :  { %3210 = vmatprep.subr.mxu0 %v4325_v47  ;;  %3256 = vmatpush3.msra.mxu1 %v4211_v20 }
 0x300   :  { %3211 = vmatpush3.msra.mxu0 %v4325_v47  ;;  %3257 = vmatprep.subr.mxu1 %v4227_v22 }
 0x301   :  { %3212 = vmatprep.subr.mxu0 %v4334_v48  ;;  %3258 = vmatpush3.msra.mxu1 %v4227_v22 }
 0x302   :  { %3213 = vmatpush3.msra.mxu0 %v4334_v48  ;;  %3259 = vmatprep.subr.mxu1 %v4239_v24 }
 0x303   :  { %3214 = vmatprep.subr.mxu0 %v4343_v8  ;;  %3260 = vmatpush3.msra.mxu1 %v4239_v24 }
 0x304   :  { %3215 = vmatpush3.msra.mxu0 %v4343_v8  ;;  %3261 = vmatprep.subr.mxu1 %v4250_v25 }
 0x305   :  { %3216 = vmatprep.subr.mxu0 %v4352_v15  ;;  %3262 = vmatpush3.msra.mxu1 %v4250_v25 }
 0x306   :  { %3217 = vmatpush3.msra.mxu0 %v4352_v15  ;;  %3263 = vmatprep.subr.mxu1 %v4256_v26 }
 0x307   :  { %3218 = vmatprep.subr.mxu0 %v4361_v49  ;;  %3264 = vmatpush3.msra.mxu1 %v4256_v26 }
 0x308   :  { %3219 = vmatpush3.msra.mxu0 %v4361_v49  ;;  %3265 = vmatprep.subr.mxu1 %v4262_v27 }
 0x309   :  { %3220 = vmatprep.subr.mxu0 %v4370_v50  ;;  %3266 = vmatpush3.msra.mxu1 %v4262_v27 }
 0x30a   :  { %3221 = vmatpush3.msra.mxu0 %v4370_v50  ;;  %3267 = vmatprep.subr.mxu1 %v4269_v29 }
 0x30b   :  { %3222 = vmatprep.subr.mxu0 %v4379_v9  ;;  %3268 = vmatpush3.msra.mxu1 %v4269_v29 }
 0x30c   :  { %3223 = vmatpush3.msra.mxu0 %v4379_v9  ;;  %3270 = vmatmul.mubr.f32.vlgmr.msra.gmra.mxu1 %v1378_v51 }
 0x30d   :  { %3224 = vmatprep.subr.mxu0 %v4388_v10  ;;  %3307 = vmatprep.subr.mxu1 %v4276_v30 }
 0x30e   :  { %3225 = vmatpush3.msra.mxu0 %v4388_v10  ;;  %3308 = vmatpush3.msra.mxu1 %v4276_v30 }
 0x30f   :  { %3226 = vmatprep.subr.mxu0 %v4397_v56  ;;  %3339 = vmatprep.mubr.f32.mxu1 %v1529_v57 }
 0x310   :  { %3227 = vmatpush3.msra.mxu0 %v4397_v56  ;;  %3309 = vmatprep.subr.mxu1 %v4300_v45 }
 0x311   :  { %3228 = vmatprep.subr.mxu0 %v2577_v59  ;;  %3310 = vmatpush3.msra.mxu1 %v4300_v45 }
 0x312   :  { %3229 = vmatpush3.msra.mxu0 %v2577_v59  ;;  %3311 = vmatprep.subr.mxu1 %v4308_v46 }
 0x313   :  { %3230 = vmatprep.subr.mxu0 %v2576_v63  ;;  %3312 = vmatpush3.msra.mxu1 %v4308_v46 }
 0x314   :  { %3231 = vmatpush3.msra.mxu0 %v2576_v63  ;;  %3313 = vmatprep.subr.mxu1 %v4316_v7 }
 0x315   :  { %3232 = vmatprep.subr.mxu0 %v2575_v1  ;;  %3314 = vmatpush3.msra.mxu1 %v4316_v7 }
 0x316   :  { %3233 = vmatpush3.msra.mxu0 %v2575_v1  ;;  %3315 = vmatprep.subr.mxu1 %v4325_v47 }
 0x317   :  { %3235 = vmatmul.mubr.f32.vlgmr.msra.gmra.mxu0 %v1279_v3  ;;  %3272 = vmatprep.subr.mxu0 %v4038_v52 }
 0x318   :  { %3273 = vmatpush3.msra.mxu0 %v4038_v52  ;;  %3304 = vmatprep.mubr.f32.mxu0 %v4281_v11  ;;  %v1530_v52 = vld [vmem:[#allocation2 + $0x22] sm:$0xff] }
 0x319   :  { %3274 = vmatprep.subr.mxu0 %v4050_v53  ;;  %3316 = vmatpush3.msra.mxu1 %v4325_v47 }
 0x31a   :  { %3275 = vmatpush3.msra.mxu0 %v4050_v53  ;;  %3317 = vmatprep.subr.mxu1 %v4334_v48  ;;  %v3619_v53 = vld [vmem:[%s4925_s4 + $0x78] sm:$0xff] }
 0x31b   :  { %3276 = vmatprep.subr.mxu0 %v4060_v55  ;;  %3318 = vmatpush3.msra.mxu1 %v4334_v48 }
 0x31c   :  { %3277 = vmatpush3.msra.mxu0 %v4060_v55  ;;  %3319 = vmatprep.subr.mxu1 %v4343_v8  ;;  %v3620_v55 = vld [vmem:[%s4925_s4 + $0x70] sm:$0xff] }
 0x31d   :  { %3278 = vmatprep.subr.mxu0 %v4080_v58  ;;  %3320 = vmatpush3.msra.mxu1 %v4343_v8 }
 0x31e   :  { %3279 = vmatpush3.msra.mxu0 %v4080_v58  ;;  %3321 = vmatprep.subr.mxu1 %v4352_v15  ;;  %v3621_v58 = vld [vmem:[%s4925_s4 + $0x68] sm:$0xff] }
 0x31f   :  { %3280 = vmatprep.subr.mxu0 %v4097_v60  ;;  %3322 = vmatpush3.msra.mxu1 %v4352_v15 }
 0x320   :  { %3281 = vmatpush3.msra.mxu0 %v4097_v60  ;;  %3323 = vmatprep.subr.mxu1 %v4361_v49  ;;  %v3622_v60 = vld [vmem:[%s4925_s4 + $0x60] sm:$0xff] }
 0x321   :  { %3282 = vmatprep.subr.mxu0 %v4111_v0  ;;  %3324 = vmatpush3.msra.mxu1 %v4361_v49 }
 0x322   :  { %3283 = vmatpush3.msra.mxu0 %v4111_v0  ;;  %3325 = vmatprep.subr.mxu1 %v4370_v50  ;;  %v3623_v0 = vld [vmem:[%s4925_s4 + $0x58] sm:$0xff] }
 0x323   :  { %3284 = vmatprep.subr.mxu0 %v4125_v2  ;;  %3326 = vmatpush3.msra.mxu1 %v4370_v50 }
 0x324   :  { %3285 = vmatpush3.msra.mxu0 %v4125_v2  ;;  %3327 = vmatprep.subr.mxu1 %v4379_v9  ;;  %v3624_v2 = vld [vmem:[%s4925_s4 + $0x50] sm:$0xff] }
 0x325   :  { %3286 = vmatprep.subr.mxu0 %v4139_v4  ;;  %3328 = vmatpush3.msra.mxu1 %v4379_v9 }
 0x326   :  { %3287 = vmatpush3.msra.mxu0 %v4139_v4  ;;  %3329 = vmatprep.subr.mxu1 %v4388_v10  ;;  %v3625_v4 = vld [vmem:[%s4925_s4 + $0x48] sm:$0xff] }
 0x327   :  { %3288 = vmatprep.subr.mxu0 %v4153_v6  ;;  %3330 = vmatpush3.msra.mxu1 %v4388_v10 }
 0x328   :  { %3289 = vmatpush3.msra.mxu0 %v4153_v6  ;;  %3331 = vmatprep.subr.mxu1 %v4397_v56  ;;  %v3627_v6 = vld [vmem:[%s4925_s4 + $0x38] sm:$0xff] }
 0x329   :  { %3290 = vmatprep.subr.mxu0 %v4167_v12  ;;  %3332 = vmatpush3.msra.mxu1 %v4397_v56 }
 0x32a   :  { %3291 = vmatpush3.msra.mxu0 %v4167_v12  ;;  %3333 = vmatprep.subr.mxu1 %v2577_v59  ;;  %v3629_v12 = vld [vmem:[%s4925_s4 + $0x28] sm:$0xff] }
 0x32b   :  { %3292 = vmatprep.subr.mxu0 %v4179_v14  ;;  %3334 = vmatpush3.msra.mxu1 %v2577_v59 }
 0x32c   :  { %3293 = vmatpush3.msra.mxu0 %v4179_v14  ;;  %3335 = vmatprep.subr.mxu1 %v2576_v63  ;;  %v3630_v14 = vld [vmem:[%s4925_s4 + $0x20] sm:$0xff] }
 0x32d   :  { %3294 = vmatprep.subr.mxu0 %v4186_v16  ;;  %3336 = vmatpush3.msra.mxu1 %v2576_v63 }
 0x32e   :  { %3295 = vmatpush3.msra.mxu0 %v4186_v16  ;;  %3337 = vmatprep.subr.mxu1 %v2575_v1  ;;  %v3631_v16 = vld [vmem:[%s4925_s4 + $0x18] sm:$0xff] }
 0x32f   :  { %3296 = vmatprep.subr.mxu0 %v4193_v17  ;;  %3338 = vmatpush3.msra.mxu1 %v2575_v1 }
 0x330   :  { %3297 = vmatpush3.msra.mxu0 %v4193_v17  ;;  %3340 = vmatmul.mubr.f32.vlgmr.msra.gmra.mxu1 %v1530_v52  ;;  %v3632_v17 = vld [vmem:[%s4925_s4 + $0x10] sm:$0xff] }
 0x331   :  { %3298 = vmatprep.subr.mxu0 %v4205_v19  ;;  %3377 = vmatprep.subr.mxu1 %v4934_v36 }
 0x332   :  { %3299 = vmatpush3.msra.mxu0 %v4205_v19  ;;  %3378 = vmatpush3.msra.mxu1 %v3619_v53  ;;  %v3634_v19 = vld [vmem:[%s4925_s4] sm:$0xff] }
 0x333   :  { %3300 = vmatprep.subr.mxu0 %v4219_v21  ;;  %3379 = vmatprep.subr.mxu1 %v4934_v36 }
 0x334   :  { %3301 = vmatpush3.msra.mxu0 %v4219_v21  ;;  %3380 = vmatpush3.msra.mxu1 %v3620_v55 }
 0x335   :  { %3302 = vmatprep.subr.mxu0 %v4233_v23  ;;  %3381 = vmatprep.subr.mxu1 %v4934_v36 }
 0x336   :  { %3303 = vmatpush3.msra.mxu0 %v4233_v23  ;;  %3382 = vmatpush3.msra.mxu1 %v3621_v58 }
 0x337   :  { %3305 = vmatmul.mubr.f32.vlgmr.msra.gmra.mxu0 %v4285_v35  ;;  %3342 = vmatprep.subr.mxu0 %v4934_v36 }
 0x338   :  { %3343 = vmatpush3.msra.mxu0 %v3619_v53  ;;  %3383 = vmatprep.subr.mxu1 %v4934_v36 }
 0x339   :  { %3344 = vmatprep.subr.mxu0 %v4934_v36  ;;  %3384 = vmatpush3.msra.mxu1 %v3622_v60 }
 0x33a   :  { %3345 = vmatpush3.msra.mxu0 %v3620_v55  ;;  %3385 = vmatprep.subr.mxu1 %v4934_v36 }
 0x33b   :  { %3346 = vmatprep.subr.mxu0 %v4934_v36  ;;  %3386 = vmatpush3.msra.mxu1 %v3623_v0 }
 0x33c   :  { %3347 = vmatpush3.msra.mxu0 %v3621_v58  ;;  %3387 = vmatprep.subr.mxu1 %v4934_v36 }
 0x33d   :  { %3348 = vmatprep.subr.mxu0 %v4934_v36  ;;  %3388 = vmatpush3.msra.mxu1 %v3624_v2 }
 0x33e   :  { %3349 = vmatpush3.msra.mxu0 %v3622_v60  ;;  %3389 = vmatprep.subr.mxu1 %v4934_v36 }
 0x33f   :  { %3350 = vmatprep.subr.mxu0 %v4934_v36  ;;  %3390 = vmatpush3.msra.mxu1 %v3625_v4 }
 0x340   :  { %3351 = vmatpush3.msra.mxu0 %v3623_v0  ;;  %3391 = vmatprep.subr.mxu1 %v4934_v36 }
 0x341   :  { %3352 = vmatprep.subr.mxu0 %v4934_v36  ;;  %3392 = vmatpush3.msra.mxu1 %v3626_v5 }
 0x342   :  { %3353 = vmatpush3.msra.mxu0 %v3624_v2  ;;  %3393 = vmatprep.subr.mxu1 %v4934_v36 }
 0x343   :  { %3354 = vmatprep.subr.mxu0 %v4934_v36  ;;  %3394 = vmatpush3.msra.mxu1 %v3627_v6 }
 0x344   :  { %3355 = vmatpush3.msra.mxu0 %v3625_v4  ;;  %3395 = vmatprep.subr.mxu1 %v4934_v36 }
 0x345   :  { %3356 = vmatprep.subr.mxu0 %v4934_v36  ;;  %3396 = vmatpush3.msra.mxu1 %v3628_v61 }
 0x346   :  { %3357 = vmatpush3.msra.mxu0 %v3626_v5  ;;  %3397 = vmatprep.subr.mxu1 %v4934_v36 }
 0x347   :  { %3358 = vmatprep.subr.mxu0 %v4934_v36  ;;  %3398 = vmatpush3.msra.mxu1 %v3629_v12 }
 0x348   :  { %3359 = vmatpush3.msra.mxu0 %v3627_v6  ;;  %3399 = vmatprep.subr.mxu1 %v4934_v36 }
 0x349   :  { %3360 = vmatprep.subr.mxu0 %v4934_v36  ;;  %3400 = vmatpush3.msra.mxu1 %v3630_v14 }
 0x34a   :  { %3361 = vmatpush3.msra.mxu0 %v3628_v61  ;;  %3401 = vmatprep.subr.mxu1 %v4934_v36 }
 0x34b   :  { %3362 = vmatprep.subr.mxu0 %v4934_v36  ;;  %3402 = vmatpush3.msra.mxu1 %v3631_v16 }
 0x34c   :  { %3363 = vmatpush3.msra.mxu0 %v3629_v12  ;;  %3403 = vmatprep.subr.mxu1 %v4934_v36 }
 0x34d   :  { %3364 = vmatprep.subr.mxu0 %v4934_v36  ;;  %3404 = vmatpush3.msra.mxu1 %v3632_v17 }
 0x34e   :  { %3365 = vmatpush3.msra.mxu0 %v3630_v14  ;;  %3405 = vmatprep.subr.mxu1 %v4934_v36 }
 0x34f   :  { %3366 = vmatprep.subr.mxu0 %v4934_v36  ;;  %3374 = vmatprep.mubr.msk.f32.mxu0 %vm3637_vm1, %v4934_v36 }
 0x350   :  { %3367 = vmatpush3.msra.mxu0 %v3631_v16  ;;  %3406 = vmatpush3.msra.mxu1 %v3633_v18 }
 0x351   :  { %3368 = vmatprep.subr.mxu0 %v4934_v36  ;;  %3407 = vmatprep.subr.mxu1 %v4934_v36 }
 0x352   :  { %3369 = vmatpush3.msra.mxu0 %v3632_v17  ;;  %3408 = vmatpush3.msra.mxu1 %v3634_v19 }
 0x353   :  { %3370 = vmatprep.subr.mxu0 %v4934_v36  ;;  %3409 = vmatprep.mubr.msk.f32.mxu1 %vm3637_vm1, %v4934_v36 }
 0x354   :  { %3371 = vmatpush3.msra.mxu0 %v3633_v18  ;;  %3419 = vmatprep.subr.mxu1 %v4934_v36 }
 0x355   :  { %3372 = vmatprep.subr.mxu0 %v4934_v36 }
 0x356   :  { %3373 = vmatpush3.msra.mxu0 %v3634_v19 }
 0x357   :  { %3412 = vmatprep.subr.mxu0 %v4934_v36 }
 0x3ab   :  { %v3201_v22 = vpop.f32.mrf.mxu1 }
 0x3ad   :  { %v1269_v24 = vpop.f32.mrf.mxu1 }
 0x3b7   :  { %v3166_v20 = vpop.f32.mrf.mxu0 }
 0x3b8   :  { %v1275_v27 = vadd.f32 %v3201_v22, %v3166_v20 }
 0x3b9   :  { %v1194_v21 = vpop.f32.mrf.mxu0 }
 0x3ba   :  { %v1270_v26 = vadd.f32 %v1269_v24, %v1194_v21  ;;  %v3635_v24 = vld [vmem:[%s4926_s3] sm:$0xf] }
 0x3cc   :  { %v3271_v33 = vpop.f32.mrf.mxu1 }
 0x3ce   :  { %v1445_v13 = vpop.f32.mrf.mxu1 }
 0x3d7   :  { %v3236_v23 = vpop.f32.mrf.mxu0 }
 0x3d8   :  { %v4560_v30 = vadd.f32 %v3236_v23, %v1275_v27 }
 0x3d9   :  { %v1346_v25 = vpop.f32.mrf.mxu0 }
 0x3da   :  { %v4558_v29 = vadd.f32 %v1346_v25, %v1270_v26  ;;  %v1366_v11 = vmul.f32 %v4560_v30, %v4560_v30  ;;  %v1820_v26 = vsub.s32 2, %v3980_v54 }
 0x3dc   :  { %v1365_v31 = vmul.f32 %v4558_v29, %v4558_v29  ;;  %v1357_v32 = vadd.f32 %v4560_v30, %v4558_v29 }
 0x3de   :  { %v1367_v34 = vadd.f32 %v1366_v11, %v1365_v31  ;;  %v1358_v35 = vrot.slane %v1357_v32, 4 }
 0x3e0   :  { %v1368_v39 = vrot.slane %v1367_v34, 4  ;;  %v1359_v42 = vadd.f32 %v1358_v35, %v1357_v32  ;;  %v1826_v32 = vsub.s32 3, %v3980_v54 }
 0x3e2   :  { %v1369_v62 = vadd.f32 %v1368_v39, %v1367_v34  ;;  %v1360_v7 = vrot.slane %v1359_v42, 2 }
 0x3e4   :  { %v1370_v15 = vrot.slane %v1369_v62, 2  ;;  %v1361_v9 = vadd.f32 %v1360_v7, %v1359_v42 }
 0x3e6   :  { %v1371_v56 = vadd.f32 %v1370_v15, %v1369_v62  ;;  %v1362_v63 = vrot.slane %v1361_v9, 1 }
 0x3e8   :  { %v1372_v53 = vrot.slane %v1371_v56, 1  ;;  %v1363_v58 = vadd.f32 %v1362_v63, %v1361_v9 }
 0x3ea   :  { %v1373_v4 = vadd.f32 %v1372_v53, %v1371_v56 }
 0x3f0   :  { %v3341_v37 = vpop.f32.mrf.mxu1 }
 0x3f2   :  { %v1597_v45 = vpop.f32.mrf.mxu1 }
 0x3f7   :  { %v3306_v38 = vpop.f32.mrf.mxu0 }
 0x3f8   :  { %v1526_v40 = vadd.f32 %v3306_v38, %v3271_v33 }
 0x3f9   :  { %v1520_v41 = vpop.f32.mrf.mxu0 }
 0x3fa   :  { %v1607_v43 = vadd.f32 %v3341_v37, %v1526_v40  ;;  %v1521_v44 = vadd.f32 %v1520_v41, %v1445_v13 }
 0x3fc   :  { %v1606_v46 = vadd.f32 %v1597_v45, %v1521_v44  ;;  %v1617_v47 = vmul.f32 %v1607_v43, %v1607_v43 }
 0x3fe   :  { %v1608_v48 = vadd.f32 %v1607_v43, %v1606_v46  ;;  %v1616_v8 = vmul.f32 %v1606_v46, %v1606_v46 }
 0x400   :  { %v1609_v49 = vrot.slane %v1608_v48, 4  ;;  %v1618_v50 = vadd.f32 %v1617_v47, %v1616_v8 }
 0x402   :  { %v1610_v51 = vadd.f32 %v1609_v49, %v1608_v48  ;;  %v1619_v10 = vrot.slane %v1618_v50, 4 }
 0x404   :  { %v1611_v57 = vrot.slane %v1610_v51, 2  ;;  %v1620_v59 = vadd.f32 %v1619_v10, %v1618_v50 }
 0x406   :  { %v1612_v1 = vadd.f32 %v1611_v57, %v1610_v51  ;;  %v1621_v3 = vrot.slane %v1620_v59, 2 }
 0x408   :  { %v1613_v52 = vrot.slane %v1612_v1, 1  ;;  %v1622_v55 = vadd.f32 %v1621_v3, %v1620_v59 }
 0x40a   :  { %v1614_v60 = vadd.f32 %v1613_v52, %v1612_v1  ;;  %v1623_v0 = vrot.slane %v1622_v55, 1 }
 0x40c   :  { %v1615_v2 = vadd.f32 %v1614_v60, %v1363_v58  ;;  %v1624_v5 = vadd.f32 %v1623_v0, %v1622_v55 }
 0x40e   :  { %3375 = vmatmul.mubr.f32.vlgmr.msra.gmra.mxu0 %v1615_v2  ;;  %v1625_v6 = vadd.f32 %v1624_v5, %v1373_v4 }
 0x40f   :  { %3416 = vmatprep.mubr.msk.f32.mxu0 %vm3637_vm1, %v4934_v36 }
 0x410   :  { %3410 = vmatmul.mubr.f32.vlgmr.msra.gmra.mxu1 %v1625_v6 }
 0x411   :  { %3423 = vmatprep.mubr.msk.f32.mxu1 %vm3637_vm1, %v4934_v36 }
 0x4ce   :  { %v1692_v61 = vpop.f32.mrf.mxu0 }
 0x4cf   :  { %v1696_v12 = vmul.f32 0.001953125, %v1692_v61 }
 0x4d0   :  { %v3376_v14 = vpop.f32.mrf.mxu0  ;;  %v1763_v16 = vpop.f32.mrf.mxu1 }
 0x4d1   :  { %v1768_v17 = vmul.f32 %v1696_v12, %v1696_v12  ;;  %v1767_v18 = vmul.f32 0.001953125, %v1763_v16 }
 0x4d2   :  { %v3411_v19 = vpop.f32.mrf.mxu1 }
 0x4d3   :  { %v1769_v20 = vsub.f32 %v1767_v18, %v1768_v17 }
 0x4d5   :  { %v1770_v21 = vadd.f32 1e-05, %v1769_v20 }
 0x4d7   :  { %3601 = vrsqrt.f32 %v1770_v21 }
 0x4e4   :  { %v3602_v22 = vpop.eup %3601 }
 0x4e5   :  { %v1773_v23 = vrot.slane %v3602_v22, 6 }
 0x4e7   :  { %v1775_v25 = vmul.f32 %v3635_v24, %v1773_v23 }
 0x4e9   :  { %v1777_v27 = vrot.slane %v1775_v25, 2  ;;  %v1821_v33 = vrot.slane %v1775_v25, %v1820_v26 }
 0x4eb   :  { %v1779_v31 = vmul.f32 %v1777_v27, %v1696_v12  ;;  %v1823_v13 = vmul.f32 %v1821_v33, %v4560_v30  ;;  %v1822_v37 = vmul.f32 %v1821_v33, %v4558_v29  ;;  %v2174_v38 = vmul.f32 %v1821_v33, %v1607_v43 }
 0x4ec   :  { %v2173_v39 = vmul.f32 %v1821_v33, %v1606_v46 }
 0x4ed   :  { %v1781_v11 = vrot.slane %v1779_v31, 5 }
 0x4ef   :  { %v1783_v34 = vsub.f32 %v3635_v24, %v1781_v11  ;;  %v4588_v11 = vld [vmem:[%s4929_s6] sm:$0xff] }
 0x4f1   :  { %v1827_v35 = vrot.slane %v1783_v34, %v1826_v32  ;;  %v4593_v32 = vld [vmem:[%s4930_s7] sm:$0xff]  ;;  %v4600_v34 = vld [vmem:[%s4931_s8 + $0x78] sm:$0xff] }
 0x4f3   :  { %v1829_v40 = vadd.f32 %v1827_v35, %v1823_v13  ;;  %v1828_v41 = vadd.f32 %v1827_v35, %v1822_v37  ;;  %v4579_v42 = vadd.f32 %v2174_v38, %v1827_v35  ;;  %v4581_v44 = vadd.f32 %v2173_v39, %v1827_v35  ;;  %v4605_v13 = vld [vmem:[%s4932_s9 + $0x78] sm:$0xff]  ;;  %v4616_v35 = vld [vmem:[%s4931_s8 + $0x70] sm:$0xff]  ;;  %v4630_v38 = vld [vmem:[%s4931_s8 + $0x68] sm:$0xff] }
 0x4f4   :  { %v4621_v37 = vld [vmem:[%s4932_s9 + $0x70] sm:$0xff]  ;;  %v4635_v39 = vld [vmem:[%s4932_s9 + $0x68] sm:$0xff] }
 0x4f5   :  { %v1833_v45 = vmul.f32 0.70710677, %v1829_v40  ;;  %v1832_v62 = vmul.f32 0.70710677, %v1828_v41  ;;  %v1831_v24 = vmul.f32 0.5, %v1829_v40  ;;  %v1830_v31 = vmul.f32 0.5, %v1828_v41 }
 0x4f6   :  { %v4644_v40 = vld [vmem:[%s4931_s8 + $0x60] sm:$0xff] }
 0x4f7   :  { %v1839_v7 = vand.u32 2147483647, %v1833_v45  ;;  %v1838_v47 = vand.u32 2147483647, %v1832_v62  ;;  %vm1835_vm7 = vcmp.ge.f32.partialorder %v1833_v45, 0.0  ;;  %vm1834_vm8 = vcmp.ge.f32.partialorder %v1832_v62, 0.0 }
 0x4f8   :  { %v1837_v19 = vsel %vm1835_vm7, 1.0, %v4936_v28  ;;  %v1836_v22 = vsel %vm1834_vm8, 1.0, %v4936_v28  ;;  %v4649_v41 = vld [vmem:[%s4932_s9 + $0x60] sm:$0xff]  ;;  %v4658_v45 = vld [vmem:[%s4931_s8 + $0x58] sm:$0xff] }
 0x4f9   :  { %v1841_v48 = vmul.f32 0.3275911, %v1839_v7  ;;  %v1840_v54 = vmul.f32 0.3275911, %v1838_v47  ;;  %v1867_v30 = vsub.f32 0.0, %v1839_v7  ;;  %v1866_v29 = vsub.f32 0.0, %v1838_v47 }
 0x4fa   :  { %v4663_v62 = vld [vmem:[%s4932_s9 + $0x58] sm:$0xff] }
 0x4fb   :  { %v1843_v8 = vadd.f32 1.0, %v1841_v48  ;;  %v1842_v15 = vadd.f32 1.0, %v1840_v54  ;;  %v1869_v43 = vmul.f32 %v1867_v30, %v1839_v7  ;;  %v1868_v46 = vmul.f32 %v1866_v29, %v1838_v47  ;;  %v4672_v7 = vld [vmem:[%s4931_s8 + $0x50] sm:$0xff]  ;;  %v4686_v48 = vld [vmem:[%s4931_s8 + $0x48] sm:$0xff]  ;;  %v4714_v30 = vld [vmem:[%s4931_s8 + $0x38] sm:$0xff] }
 0x4fc   :  { %v4677_v47 = vld [vmem:[%s4932_s9 + $0x50] sm:$0xff]  ;;  %v4691_v54 = vld [vmem:[%s4932_s9 + $0x48] sm:$0xff]  ;;  %v4719_v29 = vld [vmem:[%s4932_s9 + $0x38] sm:$0xff] }
 0x4fd   :  { %3603 = vrcp.f32 %v1843_v8  ;;  %v1872_v51 = vmul.f32 1.442695, %v1869_v43  ;;  %v1870_v56 = vmul.f32 1.442695, %v1868_v46  ;;  %v4700_v8 = vld [vmem:[%s4931_s8 + $0x40] sm:$0xff]  ;;  %v4728_v43 = vld [vmem:[%s4931_s8 + $0x30] sm:$0xff] }
 0x4fe   :  { %3605 = vrcp.f32 %v1842_v15  ;;  %v4705_v15 = vld [vmem:[%s4932_s9 + $0x40] sm:$0xff]  ;;  %v4733_v46 = vld [vmem:[%s4932_s9 + $0x30] sm:$0xff] }
 0x4ff   :  { %3607 = vpow2.f32 %v1872_v51  ;;  %v4761_v51 = vld [vmem:[%s4932_s9 + $0x20] sm:$0xff] }
 0x500   :  { %3609 = vpow2.f32 %v1870_v56  ;;  %v4775_v56 = vld [vmem:[%s4932_s9 + $0x18] sm:$0xff] }
 0x50a   :  { %v3604_v49 = vpop.eup %3603 }
 0x50b   :  { %v3606_v50 = vpop.eup %3605  ;;  %v1849_v9 = vmul.f32 1.0614054, %v3604_v49 }
 0x50c   :  { %v1848_v10 = vmul.f32 1.0614054, %v3606_v50  ;;  %v3608_v61 = vpop.eup %3607 }
 0x50d   :  { %v1851_v57 = vadd.f32 -1.4531521, %v1849_v9  ;;  %v3610_v14 = vpop.eup %3609  ;;  %v4756_v9 = vld [vmem:[%s4931_s8 + $0x20] sm:$0xff] }
 0x50e   :  { %v1850_v59 = vadd.f32 -1.4531521, %v1848_v10  ;;  %v4770_v10 = vld [vmem:[%s4931_s8 + $0x18] sm:$0xff] }
 0x50f   :  { %v1853_v63 = vmul.f32 %v3604_v49, %v1851_v57  ;;  %v4784_v57 = vld [vmem:[%s4931_s8 + $0x10] sm:$0xff] }
 0x510   :  { %v1852_v1 = vmul.f32 %v3606_v50, %v1850_v59  ;;  %v4789_v59 = vld [vmem:[%s4932_s9 + $0x10] sm:$0xff] }
 0x511   :  { %v1855_v3 = vadd.f32 1.4214138, %v1853_v63  ;;  %v4798_v63 = vld [vmem:[%s4931_s8 + $0x8] sm:$0xff] }
 0x512   :  { %v1854_v52 = vadd.f32 1.4214138, %v1852_v1  ;;  %v4803_v1 = vld [vmem:[%s4932_s9 + $0x8] sm:$0xff] }
 0x513   :  { %v1857_v53 = vmul.f32 %v3604_v49, %v1855_v3  ;;  %v4820_v3 = vld [vmem:[%s4931_s8] sm:$0xff] }
 0x514   :  { %v1856_v55 = vmul.f32 %v3606_v50, %v1854_v52  ;;  %v4825_v52 = vld [vmem:[%s4932_s9] sm:$0xff] }
 0x515   :  { %v1859_v58 = vadd.f32 -0.28449672, %v1857_v53  ;;  %v2180_v53 = vmul.f32 0.70710677, %v4579_v42 }
 0x516   :  { %v1858_v60 = vadd.f32 -0.28449672, %v1856_v55  ;;  %v2179_v55 = vmul.f32 0.70710677, %v4581_v44 }
 0x517   :  { %v1861_v0 = vmul.f32 %v3604_v49, %v1859_v58  ;;  %v2186_v58 = vand.u32 2147483647, %v2180_v53  ;;  %vm2182_vm9 = vcmp.ge.f32.partialorder %v2180_v53, 0.0 }
 0x518   :  { %v1860_v2 = vmul.f32 %v3606_v50, %v1858_v60  ;;  %v2185_v60 = vand.u32 2147483647, %v2179_v55  ;;  %vm2181_vm10 = vcmp.ge.f32.partialorder %v2179_v55, 0.0  ;;  %v4939_v55 = vmov 0.0  }
 0x519   :  { %v1863_v4 = vadd.f32 0.2548296, %v1861_v0  ;;  %v2188_v0 = vmul.f32 0.3275911, %v2186_v58 }
 0x51a   :  { %v1862_v5 = vadd.f32 0.2548296, %v1860_v2  ;;  %v2187_v2 = vmul.f32 0.3275911, %v2185_v60 }
 0x51b   :  { %v1865_v6 = vmul.f32 %v3604_v49, %v1863_v4  ;;  %v4742_v49 = vld [vmem:[%s4931_s8 + $0x28] sm:$0xff]  ;;  %v2190_v4 = vadd.f32 1.0, %v2188_v0 }
 0x51c   :  { %v1864_v12 = vmul.f32 %v3606_v50, %v1862_v5  ;;  %v4747_v50 = vld [vmem:[%s4932_s9 + $0x28] sm:$0xff]  ;;  %v2189_v5 = vadd.f32 1.0, %v2187_v2 }
 0x51d   :  { %v1875_v16 = vmul.f32 %v3608_v61, %v1865_v6  ;;  %3611 = vrcp.f32 %v2190_v4 }
 0x51e   :  { %v1874_v17 = vmul.f32 %v3610_v14, %v1864_v12  ;;  %3613 = vrcp.f32 %v2189_v5 }
 0x51f   :  { %v1877_v18 = vsub.f32 1.0, %v1875_v16 }
 0x520   :  { %v1876_v20 = vsub.f32 1.0, %v1874_v17 }
 0x521   :  { %v1879_v21 = vmul.f32 %v1877_v18, %v1837_v19  ;;  %v2214_v19 = vsub.f32 0.0, %v2186_v58 }
 0x522   :  { %v1878_v23 = vmul.f32 %v1876_v20, %v1836_v22  ;;  %v2213_v22 = vsub.f32 0.0, %v2185_v60 }
 0x523   :  { %v1881_v25 = vadd.f32 1.0, %v1879_v21 }
 0x524   :  { %v1880_v26 = vadd.f32 1.0, %v1878_v23  ;;  %v2216_v23 = vmul.f32 %v2214_v19, %v2186_v58 }
 0x525   :  { %v1883_v27 = vmul.f32 %v1881_v25, %v1831_v24 }
 0x526   :  { %v1882_v33 = vmul.f32 %v1880_v26, %v1830_v31  ;;  %v2215_v26 = vmul.f32 %v2213_v22, %v2185_v60 }
 0x527   :  { %3413 = vmatpush3.msra.mxu0 %v1883_v27  ;;  %3420 = vmatpush3.msra.mxu1 %v1883_v27  ;;  %v2219_v27 = vmul.f32 1.442695, %v2216_v23 }
 0x528   :  { %3414 = vmatprep.subr.mxu0 %v4934_v36  ;;  %3421 = vmatprep.subr.mxu1 %v4934_v36  ;;  %v2217_v0 = vmul.f32 1.442695, %v2215_v26 }
 0x529   :  { %3415 = vmatpush3.msra.mxu0 %v1882_v33  ;;  %3422 = vmatpush3.msra.mxu1 %v1882_v33  ;;  %3615 = vpow2.f32 %v2219_v27 }
 0x52a   :  { %3417 = vmatmul.mubr.msk.f32.vlgmr.msra.gmra.mxu0 %vm839_vm6, %v4588_v11  ;;  %3424 = vmatmul.mubr.msk.f32.vlgmr.msra.gmra.mxu1 %vm839_vm6, %v4593_v32  ;;  %v3612_v6 = vpop.eup %3611  ;;  %3617 = vpow2.f32 %v2217_v0 }
 0x52b   :  { %3426 = vmatprep.subr.mxu0 %v4934_v36  ;;  %3461 = vmatprep.subr.mxu1 %v4934_v36  ;;  %v3614_v61 = vpop.eup %3613  ;;  %v2196_v12 = vmul.f32 1.0614054, %v3612_v6 }
 0x52c   :  { %3427 = vmatpush3.msra.mxu0 %v4600_v34  ;;  %3462 = vmatpush3.msra.mxu1 %v4605_v13  ;;  %v2195_v14 = vmul.f32 1.0614054, %v3614_v61 }
 0x52d   :  { %3428 = vmatprep.subr.mxu0 %v4934_v36  ;;  %3463 = vmatprep.subr.mxu1 %v4934_v36  ;;  %v2198_v16 = vadd.f32 -1.4531521, %v2196_v12 }
 0x52e   :  { %3429 = vmatpush3.msra.mxu0 %v4616_v35  ;;  %3464 = vmatpush3.msra.mxu1 %v4621_v37  ;;  %v2197_v17 = vadd.f32 -1.4531521, %v2195_v14 }
 0x52f   :  { %3430 = vmatprep.subr.mxu0 %v4934_v36  ;;  %3465 = vmatprep.subr.mxu1 %v4934_v36  ;;  %v2200_v18 = vmul.f32 %v3612_v6, %v2198_v16 }
 0x530   :  { %3431 = vmatpush3.msra.mxu0 %v4630_v38  ;;  %3466 = vmatpush3.msra.mxu1 %v4635_v39  ;;  %v2199_v20 = vmul.f32 %v3614_v61, %v2197_v17 }
 0x531   :  { %3432 = vmatprep.subr.mxu0 %v4934_v36  ;;  %3467 = vmatprep.subr.mxu1 %v4934_v36  ;;  %v2202_v21 = vadd.f32 1.4214138, %v2200_v18 }
 0x532   :  { %3433 = vmatpush3.msra.mxu0 %v4644_v40  ;;  %3468 = vmatpush3.msra.mxu1 %v4649_v41  ;;  %v2201_v24 = vadd.f32 1.4214138, %v2199_v20  ;;  %v4938_v20 = vmov -1.0  }
 0x533   :  { %3434 = vmatprep.subr.mxu0 %v4934_v36  ;;  %3469 = vmatprep.subr.mxu1 %v4934_v36  ;;  %v2204_v25 = vmul.f32 %v3612_v6, %v2202_v21  ;;  %v2184_v21 = vsel %vm2182_vm9, 1.0, %v4938_v20  ;;  %v2183_v23 = vsel %vm2181_vm10, 1.0, %v4938_v20 }
 0x534   :  { %3435 = vmatpush3.msra.mxu0 %v4658_v45  ;;  %3470 = vmatpush3.msra.mxu1 %v4663_v62  ;;  %v2203_v31 = vmul.f32 %v3614_v61, %v2201_v24 }
 0x535   :  { %3436 = vmatprep.subr.mxu0 %v4934_v36  ;;  %3471 = vmatprep.subr.mxu1 %v4934_v36  ;;  %v2206_v33 = vadd.f32 -0.28449672, %v2204_v25 }
 0x536   :  { %3437 = vmatpush3.msra.mxu0 %v4672_v7  ;;  %3472 = vmatpush3.msra.mxu1 %v4677_v47  ;;  %v2205_v2 = vadd.f32 -0.28449672, %v2203_v31  ;;  %v3616_v17 = vpop.eup %3615 }
 0x537   :  { %3438 = vmatprep.subr.mxu0 %v4934_v36  ;;  %3473 = vmatprep.subr.mxu1 %v4934_v36  ;;  %v2208_v4 = vmul.f32 %v3612_v6, %v2206_v33  ;;  %v3618_v28 = vpop.eup %3617 }
 0x538   :  { %3439 = vmatpush3.msra.mxu0 %v4686_v48  ;;  %3474 = vmatpush3.msra.mxu1 %v4691_v54  ;;  %v2207_v5 = vmul.f32 %v3614_v61, %v2205_v2 }
 0x539   :  { %3440 = vmatprep.subr.mxu0 %v4934_v36  ;;  %3475 = vmatprep.subr.mxu1 %v4934_v36  ;;  %v2210_v12 = vadd.f32 0.2548296, %v2208_v4 }
 0x53a   :  { %3441 = vmatpush3.msra.mxu0 %v4700_v8  ;;  %3476 = vmatpush3.msra.mxu1 %v4705_v15  ;;  %v2209_v14 = vadd.f32 0.2548296, %v2207_v5 }
 0x53b   :  { %3442 = vmatprep.subr.mxu0 %v4934_v36  ;;  %3477 = vmatprep.subr.mxu1 %v4934_v36  ;;  %v2212_v16 = vmul.f32 %v3612_v6, %v2210_v12  ;;  %v2178_v6 = vmul.f32 0.5, %v4579_v42 }
 0x53c   :  { %3443 = vmatpush3.msra.mxu0 %v4714_v30  ;;  %3478 = vmatpush3.msra.mxu1 %v4719_v29 }
 0x53d   :  { %3444 = vmatprep.subr.mxu0 %v4934_v36  ;;  %3479 = vmatprep.subr.mxu1 %v4934_v36  ;;  %v2222_v18 = vmul.f32 %v3616_v17, %v2212_v16 }
 0x53e   :  { %3445 = vmatpush3.msra.mxu0 %v4728_v43  ;;  %3480 = vmatpush3.msra.mxu1 %v4733_v46 }
 0x53f   :  { %3446 = vmatprep.subr.mxu0 %v4934_v36  ;;  %3481 = vmatprep.subr.mxu1 %v4934_v36  ;;  %v2224_v19 = vsub.f32 1.0, %v2222_v18 }
 0x540   :  { %3447 = vmatpush3.msra.mxu0 %v4742_v49  ;;  %3482 = vmatpush3.msra.mxu1 %v4747_v50 }
 0x541   :  { %3448 = vmatprep.subr.mxu0 %v4934_v36  ;;  %3483 = vmatprep.subr.mxu1 %v4934_v36  ;;  %v2226_v22 = vmul.f32 %v2224_v19, %v2184_v21 }
 0x542   :  { %3449 = vmatpush3.msra.mxu0 %v4756_v9  ;;  %3484 = vmatpush3.msra.mxu1 %v4761_v51 }
 0x543   :  { %3450 = vmatprep.subr.mxu0 %v4934_v36  ;;  %3485 = vmatprep.subr.mxu1 %v4934_v36  ;;  %v2228_v25 = vadd.f32 1.0, %v2226_v22 }
 0x544   :  { %3451 = vmatpush3.msra.mxu0 %v4770_v10  ;;  %3486 = vmatpush3.msra.mxu1 %v4775_v56 }
 0x545   :  { %3452 = vmatprep.subr.mxu0 %v4934_v36  ;;  %3487 = vmatprep.subr.mxu1 %v4934_v36 }
 0x546   :  { %3453 = vmatpush3.msra.mxu0 %v4784_v57  ;;  %3488 = vmatpush3.msra.mxu1 %v4789_v59 }
 0x547   :  { %3454 = vmatprep.subr.mxu0 %v4934_v36  ;;  %3489 = vmatprep.subr.mxu1 %v4934_v36 }
 0x548   :  { %3455 = vmatpush3.msra.mxu0 %v4798_v63  ;;  %3490 = vmatpush3.msra.mxu1 %v4803_v1 }
 0x549   :  { %3456 = vmatprep.subr.mxu0 %v4934_v36  ;;  %3491 = vmatprep.subr.mxu1 %v4934_v36 }
 0x54a   :  { %3458 = vmatprep.mubr.msk.f32.mxu0 %vm3637_vm1, %v4934_v36  ;;  %3493 = vmatprep.mubr.msk.f32.mxu1 %vm3637_vm1, %v4934_v36 }
 0x54b   :  { %3457 = vmatpush3.msra.mxu0 %v4820_v3  ;;  %3492 = vmatpush3.msra.mxu1 %v4825_v52 }
 0x54c   :  { %3496 = vmatprep.subr.mxu0 %v4934_v36  ;;  %3503 = vmatprep.subr.mxu1 %v4934_v36  ;;  %v2211_v36 = vmul.f32 %v3614_v61, %v2209_v14 }
 0x54e   :  { %v2221_v58 = vmul.f32 %v3618_v28, %v2211_v36  ;;  %v2230_v36 = vmul.f32 %v2228_v25, %v2178_v6  ;;  %v2177_v28 = vmul.f32 0.5, %v4581_v44 }
 0x550   :  { %v2223_v60 = vsub.f32 1.0, %v2221_v58 }
 0x552   :  { %v2225_v24 = vmul.f32 %v2223_v60, %v2183_v23 }
 0x554   :  { %v2227_v61 = vadd.f32 1.0, %v2225_v24 }
 0x556   :  { %v2229_v53 = vmul.f32 %v2227_v61, %v2177_v28 }
 0x5ea   :  { %v1953_v26 = vpop.f32.mrf.mxu0  ;;  %v2026_v27 = vpop.f32.mrf.mxu1 }
 0x5eb   :  { %v2030_v31 = vmax.f32 %v1953_v26, %v2026_v27 }
 0x5ec   :  { %v3418_v33 = vpop.f32.mrf.mxu0  ;;  %v3425_v0 = vpop.f32.mrf.mxu1 }
 0x5ed   :  { %3459 = vmatmul.mubr.f32.vlgmr.msra.gmra.mxu0 %v2030_v31  ;;  %3494 = vmatmul.mubr.f32.vlgmr.msra.gmra.mxu1 %v2030_v31 }
 0x5ee   :  { %3497 = vmatpush3.msra.mxu0 %v2230_v36  ;;  %3504 = vmatpush3.msra.mxu1 %v2230_v36 }
 0x5ef   :  { %3498 = vmatprep.subr.mxu0 %v4939_v55  ;;  %3505 = vmatprep.subr.mxu1 %v4939_v55 }
 0x5f0   :  { %3499 = vmatpush3.msra.mxu0 %v2229_v53  ;;  %3506 = vmatpush3.msra.mxu1 %v2229_v53 }
 0x5f1   :  { %3500 = vmatprep.mubr.msk.f32.mxu0 %vm3637_vm1, %v4939_v55  ;;  %3507 = vmatprep.mubr.msk.f32.mxu1 %vm3637_vm1, %v4939_v55 }
 0x5f2   :  { %3501 = vmatmul.mubr.msk.f32.vlgmr.msra.gmra.mxu0 %vm839_vm6, %v4588_v11  ;;  %3508 = vmatmul.mubr.msk.f32.vlgmr.msra.gmra.mxu1 %vm839_vm6, %v4593_v32 }
 0x5f3   :  { %3510 = vmatprep.subr.mxu0 %v4939_v55  ;;  %3545 = vmatprep.subr.mxu1 %v4939_v55 }
 0x5f4   :  { %3511 = vmatpush3.msra.mxu0 %v4600_v34  ;;  %3546 = vmatpush3.msra.mxu1 %v4605_v13 }
 0x5f5   :  { %3512 = vmatprep.subr.mxu0 %v4939_v55  ;;  %3547 = vmatprep.subr.mxu1 %v4939_v55 }
 0x5f6   :  { %3513 = vmatpush3.msra.mxu0 %v4616_v35  ;;  %3548 = vmatpush3.msra.mxu1 %v4621_v37 }
 0x5f7   :  { %3514 = vmatprep.subr.mxu0 %v4939_v55  ;;  %3549 = vmatprep.subr.mxu1 %v4939_v55 }
 0x5f8   :  { %3515 = vmatpush3.msra.mxu0 %v4630_v38  ;;  %3550 = vmatpush3.msra.mxu1 %v4635_v39 }
 0x5f9   :  { %3516 = vmatprep.subr.mxu0 %v4939_v55  ;;  %3551 = vmatprep.subr.mxu1 %v4939_v55 }
 0x5fa   :  { %3517 = vmatpush3.msra.mxu0 %v4644_v40  ;;  %3552 = vmatpush3.msra.mxu1 %v4649_v41 }
 0x5fb   :  { %3518 = vmatprep.subr.mxu0 %v4939_v55  ;;  %3553 = vmatprep.subr.mxu1 %v4939_v55 }
 0x5fc   :  { %3519 = vmatpush3.msra.mxu0 %v4658_v45  ;;  %3554 = vmatpush3.msra.mxu1 %v4663_v62 }
 0x5fd   :  { %3520 = vmatprep.subr.mxu0 %v4939_v55  ;;  %3555 = vmatprep.subr.mxu1 %v4939_v55 }
 0x5fe   :  { %3521 = vmatpush3.msra.mxu0 %v4672_v7  ;;  %3556 = vmatpush3.msra.mxu1 %v4677_v47 }
 0x5ff   :  { %3522 = vmatprep.subr.mxu0 %v4939_v55  ;;  %3557 = vmatprep.subr.mxu1 %v4939_v55 }
 0x600   :  { %3523 = vmatpush3.msra.mxu0 %v4686_v48  ;;  %3558 = vmatpush3.msra.mxu1 %v4691_v54 }
 0x601   :  { %3524 = vmatprep.subr.mxu0 %v4939_v55  ;;  %3559 = vmatprep.subr.mxu1 %v4939_v55 }
 0x602   :  { %3525 = vmatpush3.msra.mxu0 %v4700_v8  ;;  %3560 = vmatpush3.msra.mxu1 %v4705_v15 }
 0x603   :  { %3526 = vmatprep.subr.mxu0 %v4939_v55  ;;  %3561 = vmatprep.subr.mxu1 %v4939_v55 }
 0x604   :  { %3527 = vmatpush3.msra.mxu0 %v4714_v30  ;;  %3562 = vmatpush3.msra.mxu1 %v4719_v29 }
 0x605   :  { %3528 = vmatprep.subr.mxu0 %v4939_v55  ;;  %3563 = vmatprep.subr.mxu1 %v4939_v55 }
 0x606   :  { %3529 = vmatpush3.msra.mxu0 %v4728_v43  ;;  %3564 = vmatpush3.msra.mxu1 %v4733_v46 }
 0x607   :  { %3530 = vmatprep.subr.mxu0 %v4939_v55  ;;  %3565 = vmatprep.subr.mxu1 %v4939_v55 }
 0x608   :  { %3531 = vmatpush3.msra.mxu0 %v4742_v49  ;;  %3566 = vmatpush3.msra.mxu1 %v4747_v50 }
 0x609   :  { %3532 = vmatprep.subr.mxu0 %v4939_v55  ;;  %3567 = vmatprep.subr.mxu1 %v4939_v55 }
 0x60a   :  { %3533 = vmatpush3.msra.mxu0 %v4756_v9  ;;  %3568 = vmatpush3.msra.mxu1 %v4761_v51 }
 0x60b   :  { %3534 = vmatprep.subr.mxu0 %v4939_v55  ;;  %3569 = vmatprep.subr.mxu1 %v4939_v55 }
 0x60c   :  { %3535 = vmatpush3.msra.mxu0 %v4770_v10  ;;  %3570 = vmatpush3.msra.mxu1 %v4775_v56 }
 0x60d   :  { %3536 = vmatprep.subr.mxu0 %v4939_v55  ;;  %3571 = vmatprep.subr.mxu1 %v4939_v55 }
 0x60e   :  { %3537 = vmatpush3.msra.mxu0 %v4784_v57  ;;  %3572 = vmatpush3.msra.mxu1 %v4789_v59 }
 0x60f   :  { %3538 = vmatprep.subr.mxu0 %v4939_v55  ;;  %3573 = vmatprep.subr.mxu1 %v4939_v55 }
 0x610   :  { %3539 = vmatpush3.msra.mxu0 %v4798_v63  ;;  %3574 = vmatpush3.msra.mxu1 %v4803_v1 }
 0x611   :  { %3540 = vmatprep.subr.mxu0 %v4939_v55  ;;  %3575 = vmatprep.subr.mxu1 %v4939_v55 }
 0x612   :  { %3541 = vmatpush3.msra.mxu0 %v4820_v3  ;;  %3542 = vmatprep.mubr.msk.f32.mxu0 %vm3637_vm1, %v4939_v55 }
 0x613   :  { %3576 = vmatpush3.msra.mxu1 %v4825_v52  ;;  %3577 = vmatprep.mubr.msk.f32.mxu1 %vm3637_vm1, %v4939_v55 }
 0x6ad   :  { %v2097_v42 = vpop.f32.mrf.mxu0  ;;  %v2167_v44 = vpop.f32.mrf.mxu1 }
 0x6ae   :  { %v2171_v11 = vmax.f32 %v2097_v42, %v2167_v44 }
 0x6af   :  { %v3460_v32 = vpop.f32.mrf.mxu0  ;;  %v3495_v34 = vpop.f32.mrf.mxu1 }
 0x6b0   :  { %2172 = vst.msk [vmem:[%s4933_s10] sm:$0xff] %vm82_vm0, %v2171_v11 }
 0x6b2   :  { %v2297_v13 = vpop.f32.mrf.mxu0  ;;  %v2367_v35 = vpop.f32.mrf.mxu1 }
 0x6b3   :  { %v2371_v37 = vmax.f32 %v2297_v13, %v2367_v35 }
 0x6b4   :  { %v3502_v38 = vpop.f32.mrf.mxu0  ;;  %v3509_v39 = vpop.f32.mrf.mxu1 }
 0x6b5   :  { %3543 = vmatmul.mubr.f32.vlgmr.msra.gmra.mxu0 %v2371_v37  ;;  %3578 = vmatmul.mubr.f32.vlgmr.msra.gmra.mxu1 %v2371_v37 }
 0x775   :  { %v2438_v40 = vpop.f32.mrf.mxu0  ;;  %v2508_v41 = vpop.f32.mrf.mxu1 }
 0x776   :  { %v2512_v45 = vmax.f32 %v2438_v40, %v2508_v41 }
 0x777   :  { %v3544_v62 = vpop.f32.mrf.mxu0  ;;  %v3579_v7 = vpop.f32.mrf.mxu1 }
 0x778   :  { %2595 = vst.msk [vmem:[%s4933_s10 + $0x8] sm:$0xff] %vm82_vm0, %v2512_v45 }

</bundles_post_ra>
